<compile_context>
chip_gen: v5e
topology: v5e:2x2
jax: 0.10.0
libtpu: 0.0.40
codegen_flags: <defaults>
</compile_context>

<pallas_src>
import math

import jax
import jax.numpy as jnp
from jax.experimental import pallas as pl
from jax.experimental.pallas import tpu as pltpu

# ----------------------------- config ---------------------------------------
B = 2            # batch
C = 4            # image channels
H = W = 16       # image spatial
PATCH = 4        # patch size
NV = (H // PATCH) * (W // PATCH)   # 16 visual tokens
D = 32           # model hidden dim
NH = 8           # history length
NF = 8           # findings length
NI = 8           # impression length (== NF so vocab logits pack into one tile)
V = 64           # vocab size
NUM_CLASSES = 8
D_BERT = 32      # "CXR-BERT" feature dim
PATCH_DIM = C * PATCH * PATCH      # 64
LANE = 128       # lane-dense output width

_BF16 = jnp.bfloat16
_F32 = jnp.float32

_DATA_NAMES = ("patches", "history", "f_embed", "i_embed")
_WEIGHT_NAMES = (
    "patch_w", "patch_b",
    "fus_wq", "fus_bq", "fus_wkv", "fus_bkv", "fus_wo", "fus_bo",
    "fd_wq", "fd_bq", "fd_wkv", "fd_bkv", "fd_wo", "fd_bo",
    "fd_vocab_w", "fd_vocab_b",
    "co_wqkv", "co_bqkv",
    "id_wq", "id_bq", "id_wkv", "id_bkv", "id_wo", "id_bo",
    "id_vocab_w", "id_vocab_b",
    "cls_w", "cls_b",
    "bert_embed",
    "bert_w", "bert_b",
)
_N_IN = len(_DATA_NAMES) + len(_WEIGHT_NAMES)


# --------------------------- fused kernel ------------------------------------
def _softmax(x):
    x = x - jnp.max(x, axis=-1, keepdims=True)
    p = jnp.exp(x)
    return p * pl.reciprocal(jnp.sum(p, axis=-1, keepdims=True), approx=True)


def _attention(q, nq, segments):
    """Per-batch scaled-dot-product cross-attention on flat (B*n, D) operands.

    q: (B*nq, D) bf16.  segments: list of (k, v, n_per_batch) with k/v (B*n, D)
    bf16; the per-batch key/value rows of all segments are concatenated (this
    implements attention over a token-axis concat of several sources).
    Returns (B*nq, D) float32.  Batch loop is statically unrolled (B=2).
    """
    scale = 1.0 / math.sqrt(D)
    outs = []
    for b in range(B):
        qb = q[b * nq:(b + 1) * nq, :]
        kb = jnp.concatenate([k[b * n:(b + 1) * n, :] for (k, _, n) in segments], axis=0)
        vb = jnp.concatenate([v[b * n:(b + 1) * n, :] for (_, v, n) in segments], axis=0)
        s = jax.lax.dot_general(qb, kb, (((1,), (1,)), ((), ())),
                                preferred_element_type=jnp.float32) * scale
        p = _softmax(s).astype(q.dtype)
        outs.append(jnp.dot(p, vb, preferred_element_type=jnp.float32))
    return jnp.concatenate(outs, axis=0)


def _himrgn_kernel(*refs):
    data_refs = refs[:len(_DATA_NAMES)]
    wt = {name: refs[len(_DATA_NAMES) + i][...] for i, name in enumerate(_WEIGHT_NAMES)}
    logits_out, cls_out, bert_out = refs[_N_IN:_N_IN + 3]

    patches = data_refs[0][...]    # (B*NV, PATCH_DIM) bf16
    history = data_refs[1][...]    # (B*NH, D)         bf16
    f_embed = data_refs[2][...]    # (B*NF, D)         bf16
    i_embed = data_refs[3][...]    # (B*NI, D)         bf16
    bf = patches.dtype

    def mm(x, wname, bname=None):
        y = jnp.dot(x, wt[wname], preferred_element_type=jnp.float32)
        if bname is not None:
            y = y + wt[bname]
        return y

    # ---------------- image_encoder: patch embedding -------------------------
    F_v = mm(patches, "patch_w", "patch_b")                      # (B*NV, D) f32
    F_v_bf = F_v.astype(bf)

    # ---------------- modality_fusion: F_v attends to history ----------------
    q = mm(F_v_bf, "fus_wq", "fus_bq").astype(bf)
    kv = mm(history, "fus_wkv", "fus_bkv")                       # (B*NH, 2D) f32
    k, v = kv[:, :D].astype(bf), kv[:, D:].astype(bf)
    ao = _attention(q, NV, [(k, v, NH)])
    fusion = F_v + mm(ao.astype(bf), "fus_wo", "fus_bo")         # residual
    fusion_bf = fusion.astype(bf)

    # ---------------- findings_decoder ---------------------------------------
    q = mm(f_embed, "fd_wq", "fd_bq").astype(bf)
    kv = mm(fusion_bf, "fd_wkv", "fd_bkv")                       # (B*NV, 2D)
    k, v = kv[:, :D].astype(bf), kv[:, D:].astype(bf)
    ao = _attention(q, NF, [(k, v, NV)])
    F_t = f_embed.astype(jnp.float32) + mm(ao.astype(bf), "fd_wo", "fd_bo")
    F_t_bf = F_t.astype(bf)
    findings_logits = mm(F_t_bf, "fd_vocab_w", "fd_vocab_b")     # (B*NF, V) f32

    # ---------------- co_attention_module (shared Q|K|V weights) -------------
    # Stack F_t and F_v along M so one (48, D) x (D, 3D) matmul serves both
    # attention directions.
    nt = B * NF
    tv = jnp.concatenate([F_t_bf, F_v_bf], axis=0)               # (B*(NF+NV), D)
    qkv = mm(tv, "co_wqkv", "co_bqkv")                           # (., 3D) f32
    qt = qkv[:nt, 0 * D:1 * D].astype(bf)
    kt = qkv[:nt, 1 * D:2 * D].astype(bf)
    vt = qkv[:nt, 2 * D:3 * D].astype(bf)
    qv = qkv[nt:, 0 * D:1 * D].astype(bf)
    kvv = qkv[nt:, 1 * D:2 * D].astype(bf)
    vvv = qkv[nt:, 2 * D:3 * D].astype(bf)
    F_t_prime = _attention(qt, NF, [(kvv, vvv, NV)])             # F_t queries F_v
    F_v_prime = _attention(qv, NV, [(kt, vt, NF)])               # F_v queries F_t

    # ---------------- impression_decoder -------------------------------------
    # K/V source = concat([F_v', F_t', F_t]) along tokens; project the stacked
    # rows with one matmul, then attend over the per-batch segments.
    kvsrc = jnp.concatenate([F_v_prime.astype(bf), F_t_prime.astype(bf), F_t_bf],
                            axis=0)                              # (B*(NV+2NF), D)
    kv = mm(kvsrc, "id_wkv", "id_bkv")                           # (., 2D) f32
    n_v, n_t = B * NV, B * NF
    kv_v, kv_tp, kv_t = kv[:n_v], kv[n_v:n_v + n_t], kv[n_v + n_t:]
    segs = [(kv_v[:, :D].astype(bf), kv_v[:, D:].astype(bf), NV),
            (kv_tp[:, :D].astype(bf), kv_tp[:, D:].astype(bf), NF),
            (kv_t[:, :D].astype(bf), kv_t[:, D:].astype(bf), NF)]
    q = mm(i_embed, "id_wq", "id_bq").astype(bf)
    ao = _attention(q, NI, segs)
    memory = i_embed.astype(jnp.float32) + mm(ao.astype(bf), "id_wo", "id_bo")
    impression_logits = mm(memory.astype(bf), "id_vocab_w", "id_vocab_b")  # (B*NI, V)

    # ---------------- packed vocab-logits output (lane-dense 2*V = 128) ------
    logits_out[...] = jnp.concatenate([findings_logits, impression_logits], axis=1)

    # ---------------- multi_label_classifier (weights padded to 128 lanes) ---
    pooled = jnp.concatenate(
        [jnp.mean(memory[b * NI:(b + 1) * NI, :], axis=0, keepdims=True)
         for b in range(B)], axis=0)                             # (B, D) f32
    cls_out[...] = mm(pooled.astype(bf), "cls_w", "cls_b")       # (B, 128)

    # ---------------- cxr_bert_feature_extractor (both streams in one pass) --
    # TODO(synk): real CXR-BERT tokenizes generated text; here features come
    # from a softmax-weighted embedding lookup of the logits.
    all_logits = jnp.concatenate([findings_logits, impression_logits], axis=0)
    probs = _softmax(all_logits).astype(bf)                      # (B*(NF+NI), V)
    feat = jnp.dot(probs, wt["bert_embed"], preferred_element_type=jnp.float32)
    bounds = [0]
    for n in [NF] * B + [NI] * B:
        bounds.append(bounds[-1] + n)
    pooled_fi = jnp.concatenate(
        [jnp.mean(feat[bounds[g]:bounds[g + 1], :], axis=0, keepdims=True)
         for g in range(2 * B)], axis=0)                         # rows: F_b0,F_b1,I_b0,I_b1
    bert_out[...] = mm(pooled_fi.astype(bf), "bert_w", "bert_b")  # (2B, 128)


# --------------------------- pallas_call wrapper ------------------------------
def _full_spec(shape):
    nd = len(shape)
    return pl.BlockSpec(shape, lambda i, nd=nd: (0,) * nd)


def _fused_call(inputs):
    out_shape = (
        jax.ShapeDtypeStruct((B * NF, 2 * V), _F32),   # [findings | impression] logits
        jax.ShapeDtypeStruct((B, LANE), _F32),         # class logits (padded)
        jax.ShapeDtypeStruct((2 * B, LANE), _F32),     # [F_F ; F_I] (padded)
    )
    return pl.pallas_call(
        _himrgn_kernel,
        out_shape=out_shape,
        grid=(1,),
        in_specs=[_full_spec(a.shape) for a in inputs],
        out_specs=tuple(_full_spec(s.shape) for s in out_shape),
        compiler_params=pltpu.CompilerParams(dimension_semantics=("arbitrary",)),
    )(*inputs)


# --------------------------- parameters --------------------------------------
def init_params(key):
    shapes = {
        "patch_w": (PATCH_DIM, D), "patch_b": (D,),
        "fus_wq": (D, D), "fus_bq": (D,), "fus_wk": (D, D), "fus_bk": (D,),
        "fus_wv": (D, D), "fus_bv": (D,), "fus_wo": (D, D), "fus_bo": (D,),
        "tok_embed": (V, D),
        "fd_wq": (D, D), "fd_bq": (D,), "fd_wk": (D, D), "fd_bk": (D,),
        "fd_wv": (D, D), "fd_bv": (D,), "fd_wo": (D, D), "fd_bo": (D,),
        "fd_vocab_w": (D, V), "fd_vocab_b": (V,),
        "co_wq": (D, D), "co_bq": (D,), "co_wk": (D, D), "co_bk": (D,),
        "co_wv": (D, D), "co_bv": (D,),
        "id_wq": (D, D), "id_bq": (D,), "id_wk": (D, D), "id_bk": (D,),
        "id_wv": (D, D), "id_bv": (D,), "id_wo": (D, D), "id_bo": (D,),
        "id_vocab_w": (D, V), "id_vocab_b": (V,),
        "cls_w": (D, NUM_CLASSES), "cls_b": (NUM_CLASSES,),
        "bert_embed": (V, D_BERT), "bert_w": (D_BERT, D_BERT), "bert_b": (D_BERT,),
    }
    params = {}
    for i, name in enumerate(sorted(shapes)):
        k = jax.random.fold_in(key, i)
        params[name] = 0.02 * jax.random.normal(k, shapes[name], jnp.float32)
    return params


def _prepare_inputs(params, img, findings_tokens, impression_tokens, history):
    """Plain-JAX glue: patching, embedding lookup, weight packing (bf16 + concat)."""
    b = img.shape[0]
    p = PATCH
    x = img.reshape(b, C, H // p, p, W // p, p)
    x = x.transpose(0, 2, 4, 1, 3, 5).reshape(b * NV, PATCH_DIM)
    patches = x.astype(_BF16)
    hist = history.reshape(b * NH, D).astype(_BF16)
    f_embed = params["tok_embed"][findings_tokens].reshape(b * NF, D).astype(_BF16)
    i_embed = params["tok_embed"][impression_tokens].reshape(b * NI, D).astype(_BF16)

    def wmat(m):
        return m.astype(_BF16)

    def brow(v):
        return v.reshape(1, -1).astype(_F32)

    def pad_lanes(m, n):
        return jnp.pad(m, ((0, 0), (0, n - m.shape[-1])))

    pk = params
    weights = {
        "patch_w": wmat(pk["patch_w"]), "patch_b": brow(pk["patch_b"]),
        "fus_wq": wmat(pk["fus_wq"]), "fus_bq": brow(pk["fus_bq"]),
        "fus_wkv": wmat(jnp.concatenate([pk["fus_wk"], pk["fus_wv"]], axis=1)),
        "fus_bkv": brow(jnp.concatenate([pk["fus_bk"], pk["fus_bv"]])),
        "fus_wo": wmat(pk["fus_wo"]), "fus_bo": brow(pk["fus_bo"]),
        "fd_wq": wmat(pk["fd_wq"]), "fd_bq": brow(pk["fd_bq"]),
        "fd_wkv": wmat(jnp.concatenate([pk["fd_wk"], pk["fd_wv"]], axis=1)),
        "fd_bkv": brow(jnp.concatenate([pk["fd_bk"], pk["fd_bv"]])),
        "fd_wo": wmat(pk["fd_wo"]), "fd_bo": brow(pk["fd_bo"]),
        "fd_vocab_w": wmat(pk["fd_vocab_w"]), "fd_vocab_b": brow(pk["fd_vocab_b"]),
        "co_wqkv": wmat(jnp.concatenate([pk["co_wq"], pk["co_wk"], pk["co_wv"]], axis=1)),
        "co_bqkv": brow(jnp.concatenate([pk["co_bq"], pk["co_bk"], pk["co_bv"]])),
        "id_wq": wmat(pk["id_wq"]), "id_bq": brow(pk["id_bq"]),
        "id_wkv": wmat(jnp.concatenate([pk["id_wk"], pk["id_wv"]], axis=1)),
        "id_bkv": brow(jnp.concatenate([pk["id_bk"], pk["id_bv"]])),
        "id_wo": wmat(pk["id_wo"]), "id_bo": brow(pk["id_bo"]),
        "id_vocab_w": wmat(pk["id_vocab_w"]), "id_vocab_b": brow(pk["id_vocab_b"]),
        "cls_w": wmat(pad_lanes(pk["cls_w"], LANE)),
        "cls_b": brow(pad_lanes(pk["cls_b"].reshape(1, -1), LANE)),
        "bert_embed": wmat(pk["bert_embed"]),
        "bert_w": wmat(pad_lanes(pk["bert_w"], LANE)),
        "bert_b": brow(pad_lanes(pk["bert_b"].reshape(1, -1), LANE)),
    }
    data = {"patches": patches, "history": hist, "f_embed": f_embed, "i_embed": i_embed}
    return [data[n] for n in _DATA_NAMES] + [weights[n] for n in _WEIGHT_NAMES]


# ------------------------------ HiMrGn forward -------------------------------
def himrgn_forward(params, image, findings=None, impression=None, history=None,
                   train_stage=2):
    img = image[0]
    if train_stage == 1:
        # Impression path is strictly downstream of the findings outputs, so
        # running the fused kernel with dummy impression tokens and discarding
        # the impression results preserves stage-1 semantics.
        impression_tokens = jnp.zeros((img.shape[0], NI), jnp.int32)
    else:
        impression_tokens = impression

    inputs = _prepare_inputs(params, img, findings, impression_tokens, history)
    logits_packed, cls_packed, bert_packed = _fused_call(inputs)

    findings_logits = logits_packed[:, :V].reshape(B, NF, V)
    impression_logits = logits_packed[:, V:].reshape(B, NI, V)
    findings_text = jnp.argmax(findings_logits, axis=-1)

    if train_stage == 1:
        return {"findings": findings_logits, "findings_text": findings_text,
                "impression": None, "impression_text": None,
                "F_F": None, "F_I": None, "class_logits": None}

    impression_text = jnp.argmax(impression_logits, axis=-1)
    class_logits = cls_packed[:, :NUM_CLASSES]
    F_F = bert_packed[:B, :D_BERT]
    F_I = bert_packed[B:, :D_BERT]
    return {"findings": findings_logits, "findings_text": findings_text,
            "impression": impression_logits, "impression_text": impression_text,
            "F_F": F_F, "F_I": F_I, "class_logits": class_logits}


# --------------------------------- main ---------------------------------------
if __name__ == "__main__":
    root = jax.random.PRNGKey(0)
    k_par, k_img, k_hist, k_fin, k_imp = jax.random.split(root, 5)

    params = init_params(k_par)

    img0 = jax.random.normal(k_img, (B, C, H, W), jnp.float32)
    image = (img0,)
    history = jax.random.normal(k_hist, (B, NH, D), jnp.float32)
    findings_tokens = jax.random.randint(k_fin, (B, NF), 0, V, jnp.int32)
    impression_tokens = jax.random.randint(k_imp, (B, NI), 0, V, jnp.int32)

    fwd = jax.jit(lambda p, im, f, i, h: himrgn_forward(
        p, im, findings=f, impression=i, history=h, train_stage=2))
    out = fwd(params, image, findings_tokens, impression_tokens, history)
    out = jax.block_until_ready(out)

    assert out["findings"].shape == (B, NF, V)
    assert out["impression"].shape == (B, NI, V)
    assert out["class_logits"].shape == (B, NUM_CLASSES)
    assert out["F_F"].shape == (B, D_BERT)
    assert out["F_I"].shape == (B, D_BERT)
    assert out["findings_text"].shape == (B, NF)
    assert out["impression_text"].shape == (B, NI)

    print("KERNEL_OK")
</pallas_src>

<mosaic_0001>
module attributes {stable_mosaic.version = 11 : i64} {
  func.func @_himrgn_kernel(%arg0: i32, %arg1: memref<32x64xbf16, #tpu.memory_space<vmem>>, %arg2: memref<16x32xbf16, #tpu.memory_space<vmem>>, %arg3: memref<16x32xbf16, #tpu.memory_space<vmem>>, %arg4: memref<16x32xbf16, #tpu.memory_space<vmem>>, %arg5: memref<64x32xbf16, #tpu.memory_space<vmem>>, %arg6: memref<1x32xf32, #tpu.memory_space<vmem>>, %arg7: memref<32x32xbf16, #tpu.memory_space<vmem>>, %arg8: memref<1x32xf32, #tpu.memory_space<vmem>>, %arg9: memref<32x64xbf16, #tpu.memory_space<vmem>>, %arg10: memref<1x64xf32, #tpu.memory_space<vmem>>, %arg11: memref<32x32xbf16, #tpu.memory_space<vmem>>, %arg12: memref<1x32xf32, #tpu.memory_space<vmem>>, %arg13: memref<32x32xbf16, #tpu.memory_space<vmem>>, %arg14: memref<1x32xf32, #tpu.memory_space<vmem>>, %arg15: memref<32x64xbf16, #tpu.memory_space<vmem>>, %arg16: memref<1x64xf32, #tpu.memory_space<vmem>>, %arg17: memref<32x32xbf16, #tpu.memory_space<vmem>>, %arg18: memref<1x32xf32, #tpu.memory_space<vmem>>, %arg19: memref<32x64xbf16, #tpu.memory_space<vmem>>, %arg20: memref<1x64xf32, #tpu.memory_space<vmem>>, %arg21: memref<32x96xbf16, #tpu.memory_space<vmem>>, %arg22: memref<1x96xf32, #tpu.memory_space<vmem>>, %arg23: memref<32x32xbf16, #tpu.memory_space<vmem>>, %arg24: memref<1x32xf32, #tpu.memory_space<vmem>>, %arg25: memref<32x64xbf16, #tpu.memory_space<vmem>>, %arg26: memref<1x64xf32, #tpu.memory_space<vmem>>, %arg27: memref<32x32xbf16, #tpu.memory_space<vmem>>, %arg28: memref<1x32xf32, #tpu.memory_space<vmem>>, %arg29: memref<32x64xbf16, #tpu.memory_space<vmem>>, %arg30: memref<1x64xf32, #tpu.memory_space<vmem>>, %arg31: memref<32x128xbf16, #tpu.memory_space<vmem>>, %arg32: memref<1x128xf32, #tpu.memory_space<vmem>>, %arg33: memref<64x32xbf16, #tpu.memory_space<vmem>>, %arg34: memref<32x128xbf16, #tpu.memory_space<vmem>>, %arg35: memref<1x128xf32, #tpu.memory_space<vmem>>, %arg36: memref<16x128xf32, #tpu.memory_space<vmem>>, %arg37: memref<2x128xf32, #tpu.memory_space<vmem>>, %arg38: memref<4x128xf32, #tpu.memory_space<vmem>>) attributes {dimension_semantics = [#tpu.dimension_semantics<arbitrary>], iteration_bounds = array<i64: 1>, scalar_prefetch = 0 : i64, scratch_operands = 0 : i64, tpu.core_type = #tpu.core_type<tc>, window_params = [{pipeline_mode = #tpu.pipeline_mode<synchronous>, transform_indices = @transform_0, window_bounds = array<i64: 32, 64>}, {pipeline_mode = #tpu.pipeline_mode<synchronous>, transform_indices = @transform_1, window_bounds = array<i64: 16, 32>}, {pipeline_mode = #tpu.pipeline_mode<synchronous>, transform_indices = @transform_2, window_bounds = array<i64: 16, 32>}, {pipeline_mode = #tpu.pipeline_mode<synchronous>, transform_indices = @transform_3, window_bounds = array<i64: 16, 32>}, {pipeline_mode = #tpu.pipeline_mode<synchronous>, transform_indices = @transform_4, window_bounds = array<i64: 64, 32>}, {pipeline_mode = #tpu.pipeline_mode<synchronous>, transform_indices = @transform_5, window_bounds = array<i64: 1, 32>}, {pipeline_mode = #tpu.pipeline_mode<synchronous>, transform_indices = @transform_6, window_bounds = array<i64: 32, 32>}, {pipeline_mode = #tpu.pipeline_mode<synchronous>, transform_indices = @transform_7, window_bounds = array<i64: 1, 32>}, {pipeline_mode = #tpu.pipeline_mode<synchronous>, transform_indices = @transform_8, window_bounds = array<i64: 32, 64>}, {pipeline_mode = #tpu.pipeline_mode<synchronous>, transform_indices = @transform_9, window_bounds = array<i64: 1, 64>}, {pipeline_mode = #tpu.pipeline_mode<synchronous>, transform_indices = @transform_10, window_bounds = array<i64: 32, 32>}, {pipeline_mode = #tpu.pipeline_mode<synchronous>, transform_indices = @transform_11, window_bounds = array<i64: 1, 32>}, {pipeline_mode = #tpu.pipeline_mode<synchronous>, transform_indices = @transform_12, window_bounds = array<i64: 32, 32>}, {pipeline_mode = #tpu.pipeline_mode<synchronous>, transform_indices = @transform_13, window_bounds = array<i64: 1, 32>}, {pipeline_mode = #tpu.pipeline_mode<synchronous>, transform_indices = @transform_14, window_bounds = array<i64: 32, 64>}, {pipeline_mode = #tpu.pipeline_mode<synchronous>, transform_indices = @transform_15, window_bounds = array<i64: 1, 64>}, {pipeline_mode = #tpu.pipeline_mode<synchronous>, transform_indices = @transform_16, window_bounds = array<i64: 32, 32>}, {pipeline_mode = #tpu.pipeline_mode<synchronous>, transform_indices = @transform_17, window_bounds = array<i64: 1, 32>}, {pipeline_mode = #tpu.pipeline_mode<synchronous>, transform_indices = @transform_18, window_bounds = array<i64: 32, 64>}, {pipeline_mode = #tpu.pipeline_mode<synchronous>, transform_indices = @transform_19, window_bounds = array<i64: 1, 64>}, {pipeline_mode = #tpu.pipeline_mode<synchronous>, transform_indices = @transform_20, window_bounds = array<i64: 32, 96>}, {pipeline_mode = #tpu.pipeline_mode<synchronous>, transform_indices = @transform_21, window_bounds = array<i64: 1, 96>}, {pipeline_mode = #tpu.pipeline_mode<synchronous>, transform_indices = @transform_22, window_bounds = array<i64: 32, 32>}, {pipeline_mode = #tpu.pipeline_mode<synchronous>, transform_indices = @transform_23, window_bounds = array<i64: 1, 32>}, {pipeline_mode = #tpu.pipeline_mode<synchronous>, transform_indices = @transform_24, window_bounds = array<i64: 32, 64>}, {pipeline_mode = #tpu.pipeline_mode<synchronous>, transform_indices = @transform_25, window_bounds = array<i64: 1, 64>}, {pipeline_mode = #tpu.pipeline_mode<synchronous>, transform_indices = @transform_26, window_bounds = array<i64: 32, 32>}, {pipeline_mode = #tpu.pipeline_mode<synchronous>, transform_indices = @transform_27, window_bounds = array<i64: 1, 32>}, {pipeline_mode = #tpu.pipeline_mode<synchronous>, transform_indices = @transform_28, window_bounds = array<i64: 32, 64>}, {pipeline_mode = #tpu.pipeline_mode<synchronous>, transform_indices = @transform_29, window_bounds = array<i64: 1, 64>}, {pipeline_mode = #tpu.pipeline_mode<synchronous>, transform_indices = @transform_30, window_bounds = array<i64: 32, 128>}, {pipeline_mode = #tpu.pipeline_mode<synchronous>, transform_indices = @transform_31, window_bounds = array<i64: 1, 128>}, {pipeline_mode = #tpu.pipeline_mode<synchronous>, transform_indices = @transform_32, window_bounds = array<i64: 64, 32>}, {pipeline_mode = #tpu.pipeline_mode<synchronous>, transform_indices = @transform_33, window_bounds = array<i64: 32, 128>}, {pipeline_mode = #tpu.pipeline_mode<synchronous>, transform_indices = @transform_34, window_bounds = array<i64: 1, 128>}, {pipeline_mode = #tpu.pipeline_mode<synchronous>, transform_indices = @transform_35, window_bounds = array<i64: 16, 128>}, {pipeline_mode = #tpu.pipeline_mode<synchronous>, transform_indices = @transform_36, window_bounds = array<i64: 2, 128>}, {pipeline_mode = #tpu.pipeline_mode<synchronous>, transform_indices = @transform_37, window_bounds = array<i64: 4, 128>}]} {
    %c0 = arith.constant 0 : index
    %c0_0 = arith.constant 0 : index
    %0 = vector.load %arg5[%c0, %c0_0] : memref<64x32xbf16, #tpu.memory_space<vmem>>, vector<64x32xbf16>
    %c0_1 = arith.constant 0 : index
    %c0_2 = arith.constant 0 : index
    %1 = vector.load %arg6[%c0_1, %c0_2] : memref<1x32xf32, #tpu.memory_space<vmem>>, vector<1x32xf32>
    %c0_3 = arith.constant 0 : index
    %c0_4 = arith.constant 0 : index
    %2 = vector.load %arg7[%c0_3, %c0_4] : memref<32x32xbf16, #tpu.memory_space<vmem>>, vector<32x32xbf16>
    %c0_5 = arith.constant 0 : index
    %c0_6 = arith.constant 0 : index
    %3 = vector.load %arg8[%c0_5, %c0_6] : memref<1x32xf32, #tpu.memory_space<vmem>>, vector<1x32xf32>
    %c0_7 = arith.constant 0 : index
    %c0_8 = arith.constant 0 : index
    %4 = vector.load %arg9[%c0_7, %c0_8] : memref<32x64xbf16, #tpu.memory_space<vmem>>, vector<32x64xbf16>
    %c0_9 = arith.constant 0 : index
    %c0_10 = arith.constant 0 : index
    %5 = vector.load %arg10[%c0_9, %c0_10] : memref<1x64xf32, #tpu.memory_space<vmem>>, vector<1x64xf32>
    %c0_11 = arith.constant 0 : index
    %c0_12 = arith.constant 0 : index
    %6 = vector.load %arg11[%c0_11, %c0_12] : memref<32x32xbf16, #tpu.memory_space<vmem>>, vector<32x32xbf16>
    %c0_13 = arith.constant 0 : index
    %c0_14 = arith.constant 0 : index
    %7 = vector.load %arg12[%c0_13, %c0_14] : memref<1x32xf32, #tpu.memory_space<vmem>>, vector<1x32xf32>
    %c0_15 = arith.constant 0 : index
    %c0_16 = arith.constant 0 : index
    %8 = vector.load %arg13[%c0_15, %c0_16] : memref<32x32xbf16, #tpu.memory_space<vmem>>, vector<32x32xbf16>
    %c0_17 = arith.constant 0 : index
    %c0_18 = arith.constant 0 : index
    %9 = vector.load %arg14[%c0_17, %c0_18] : memref<1x32xf32, #tpu.memory_space<vmem>>, vector<1x32xf32>
    %c0_19 = arith.constant 0 : index
    %c0_20 = arith.constant 0 : index
    %10 = vector.load %arg15[%c0_19, %c0_20] : memref<32x64xbf16, #tpu.memory_space<vmem>>, vector<32x64xbf16>
    %c0_21 = arith.constant 0 : index
    %c0_22 = arith.constant 0 : index
    %11 = vector.load %arg16[%c0_21, %c0_22] : memref<1x64xf32, #tpu.memory_space<vmem>>, vector<1x64xf32>
    %c0_23 = arith.constant 0 : index
    %c0_24 = arith.constant 0 : index
    %12 = vector.load %arg17[%c0_23, %c0_24] : memref<32x32xbf16, #tpu.memory_space<vmem>>, vector<32x32xbf16>
    %c0_25 = arith.constant 0 : index
    %c0_26 = arith.constant 0 : index
    %13 = vector.load %arg18[%c0_25, %c0_26] : memref<1x32xf32, #tpu.memory_space<vmem>>, vector<1x32xf32>
    %c0_27 = arith.constant 0 : index
    %c0_28 = arith.constant 0 : index
    %14 = vector.load %arg19[%c0_27, %c0_28] : memref<32x64xbf16, #tpu.memory_space<vmem>>, vector<32x64xbf16>
    %c0_29 = arith.constant 0 : index
    %c0_30 = arith.constant 0 : index
    %15 = vector.load %arg20[%c0_29, %c0_30] : memref<1x64xf32, #tpu.memory_space<vmem>>, vector<1x64xf32>
    %c0_31 = arith.constant 0 : index
    %c0_32 = arith.constant 0 : index
    %16 = vector.load %arg21[%c0_31, %c0_32] : memref<32x96xbf16, #tpu.memory_space<vmem>>, vector<32x96xbf16>
    %c0_33 = arith.constant 0 : index
    %c0_34 = arith.constant 0 : index
    %17 = vector.load %arg22[%c0_33, %c0_34] : memref<1x96xf32, #tpu.memory_space<vmem>>, vector<1x96xf32>
    %c0_35 = arith.constant 0 : index
    %c0_36 = arith.constant 0 : index
    %18 = vector.load %arg23[%c0_35, %c0_36] : memref<32x32xbf16, #tpu.memory_space<vmem>>, vector<32x32xbf16>
    %c0_37 = arith.constant 0 : index
    %c0_38 = arith.constant 0 : index
    %19 = vector.load %arg24[%c0_37, %c0_38] : memref<1x32xf32, #tpu.memory_space<vmem>>, vector<1x32xf32>
    %c0_39 = arith.constant 0 : index
    %c0_40 = arith.constant 0 : index
    %20 = vector.load %arg25[%c0_39, %c0_40] : memref<32x64xbf16, #tpu.memory_space<vmem>>, vector<32x64xbf16>
    %c0_41 = arith.constant 0 : index
    %c0_42 = arith.constant 0 : index
    %21 = vector.load %arg26[%c0_41, %c0_42] : memref<1x64xf32, #tpu.memory_space<vmem>>, vector<1x64xf32>
    %c0_43 = arith.constant 0 : index
    %c0_44 = arith.constant 0 : index
    %22 = vector.load %arg27[%c0_43, %c0_44] : memref<32x32xbf16, #tpu.memory_space<vmem>>, vector<32x32xbf16>
    %c0_45 = arith.constant 0 : index
    %c0_46 = arith.constant 0 : index
    %23 = vector.load %arg28[%c0_45, %c0_46] : memref<1x32xf32, #tpu.memory_space<vmem>>, vector<1x32xf32>
    %c0_47 = arith.constant 0 : index
    %c0_48 = arith.constant 0 : index
    %24 = vector.load %arg29[%c0_47, %c0_48] : memref<32x64xbf16, #tpu.memory_space<vmem>>, vector<32x64xbf16>
    %c0_49 = arith.constant 0 : index
    %c0_50 = arith.constant 0 : index
    %25 = vector.load %arg30[%c0_49, %c0_50] : memref<1x64xf32, #tpu.memory_space<vmem>>, vector<1x64xf32>
    %c0_51 = arith.constant 0 : index
    %c0_52 = arith.constant 0 : index
    %26 = vector.load %arg31[%c0_51, %c0_52] : memref<32x128xbf16, #tpu.memory_space<vmem>>, vector<32x128xbf16>
    %c0_53 = arith.constant 0 : index
    %c0_54 = arith.constant 0 : index
    %27 = vector.load %arg32[%c0_53, %c0_54] : memref<1x128xf32, #tpu.memory_space<vmem>>, vector<1x128xf32>
    %c0_55 = arith.constant 0 : index
    %c0_56 = arith.constant 0 : index
    %28 = vector.load %arg33[%c0_55, %c0_56] : memref<64x32xbf16, #tpu.memory_space<vmem>>, vector<64x32xbf16>
    %c0_57 = arith.constant 0 : index
    %c0_58 = arith.constant 0 : index
    %29 = vector.load %arg34[%c0_57, %c0_58] : memref<32x128xbf16, #tpu.memory_space<vmem>>, vector<32x128xbf16>
    %c0_59 = arith.constant 0 : index
    %c0_60 = arith.constant 0 : index
    %30 = vector.load %arg35[%c0_59, %c0_60] : memref<1x128xf32, #tpu.memory_space<vmem>>, vector<1x128xf32>
    %c0_61 = arith.constant 0 : index
    %c0_62 = arith.constant 0 : index
    %31 = vector.load %arg1[%c0_61, %c0_62] : memref<32x64xbf16, #tpu.memory_space<vmem>>, vector<32x64xbf16>
    %c0_63 = arith.constant 0 : index
    %c0_64 = arith.constant 0 : index
    %32 = vector.load %arg2[%c0_63, %c0_64] : memref<16x32xbf16, #tpu.memory_space<vmem>>, vector<16x32xbf16>
    %c0_65 = arith.constant 0 : index
    %c0_66 = arith.constant 0 : index
    %33 = vector.load %arg3[%c0_65, %c0_66] : memref<16x32xbf16, #tpu.memory_space<vmem>>, vector<16x32xbf16>
    %c0_67 = arith.constant 0 : index
    %c0_68 = arith.constant 0 : index
    %34 = vector.load %arg4[%c0_67, %c0_68] : memref<16x32xbf16, #tpu.memory_space<vmem>>, vector<16x32xbf16>
    %cst = arith.constant dense<0.000000e+00> : vector<32x32xf32>
    %35 = tpu.matmul %31, %0, %cst {dimension_numbers = #tpu.dot_dimension_numbers<[1], [0], [0], [1], [0, 0, 1, 1], [], []>} : vector<32x64xbf16>, vector<64x32xbf16>, vector<32x32xf32> -> vector<32x32xf32>
    %36 = vector.broadcast %1 : vector<1x32xf32> to vector<32x32xf32>
    %37 = arith.addf %35, %36 : vector<32x32xf32>
    %38 = arith.truncf %37 : vector<32x32xf32> to vector<32x32xbf16>
    %cst_69 = arith.constant dense<0.000000e+00> : vector<32x32xf32>
    %39 = tpu.matmul %38, %2, %cst_69 {dimension_numbers = #tpu.dot_dimension_numbers<[1], [0], [0], [1], [0, 0, 1, 1], [], []>} : vector<32x32xbf16>, vector<32x32xbf16>, vector<32x32xf32> -> vector<32x32xf32>
    %40 = vector.broadcast %3 : vector<1x32xf32> to vector<32x32xf32>
    %41 = arith.addf %39, %40 : vector<32x32xf32>
    %42 = arith.truncf %41 : vector<32x32xf32> to vector<32x32xbf16>
    %cst_70 = arith.constant dense<0.000000e+00> : vector<16x64xf32>
    %43 = tpu.matmul %32, %4, %cst_70 {dimension_numbers = #tpu.dot_dimension_numbers<[1], [0], [0], [1], [0, 0, 1, 1], [], []>} : vector<16x32xbf16>, vector<32x64xbf16>, vector<16x64xf32> -> vector<16x64xf32>
    %44 = vector.broadcast %5 : vector<1x64xf32> to vector<16x64xf32>
    %45 = arith.addf %43, %44 : vector<16x64xf32>
    %46 = vector.extract_strided_slice %45 {offsets = [0, 0], sizes = [16, 32], strides = [1, 1]} : vector<16x64xf32> to vector<16x32xf32>
    %47 = arith.truncf %46 : vector<16x32xf32> to vector<16x32xbf16>
    %48 = vector.extract_strided_slice %45 {offsets = [0, 32], sizes = [16, 32], strides = [1, 1]} : vector<16x64xf32> to vector<16x32xf32>
    %49 = arith.truncf %48 : vector<16x32xf32> to vector<16x32xbf16>
    %50 = vector.extract_strided_slice %42 {offsets = [0, 0], sizes = [16, 32], strides = [1, 1]} : vector<32x32xbf16> to vector<16x32xbf16>
    %51 = vector.extract_strided_slice %47 {offsets = [0, 0], sizes = [8, 32], strides = [1, 1]} : vector<16x32xbf16> to vector<8x32xbf16>
    %52 = vector.extract_strided_slice %49 {offsets = [0, 0], sizes = [8, 32], strides = [1, 1]} : vector<16x32xbf16> to vector<8x32xbf16>
    %cst_71 = arith.constant dense<0.000000e+00> : vector<16x8xf32>
    %53 = tpu.matmul %50, %51, %cst_71 {dimension_numbers = #tpu.dot_dimension_numbers<[1], [1], [0], [0], [0, 0, 1, 0], [], []>} : vector<16x32xbf16>, vector<8x32xbf16>, vector<16x8xf32> -> vector<16x8xf32>
    %cst_72 = arith.constant 0.176776692 : f32
    %54 = vector.broadcast %cst_72 : f32 to vector<16x8xf32>
    %55 = arith.mulf %53, %54 : vector<16x8xf32>
    %cst_73 = arith.constant dense<0xFF800000> : vector<16xf32>
    %56 = vector.multi_reduction <maximumf>, %55, %cst_73 [1] : vector<16x8xf32> to vector<16xf32>
    %57 = vector.shape_cast %56 : vector<16xf32> to vector<16x1xf32>
    %58 = vector.broadcast %57 : vector<16x1xf32> to vector<16x8xf32>
    %59 = arith.subf %55, %58 : vector<16x8xf32>
    %60 = math.exp %59 : vector<16x8xf32>
    %cst_74 = arith.constant dense<0.000000e+00> : vector<16xf32>
    %61 = vector.multi_reduction <add>, %60, %cst_74 [1] : vector<16x8xf32> to vector<16xf32>
    %62 = vector.shape_cast %61 : vector<16xf32> to vector<16x1xf32>
    %63 = tpu.reciprocal %62 {approx = true} : vector<16x1xf32> -> vector<16x1xf32>
    %64 = vector.broadcast %63 : vector<16x1xf32> to vector<16x8xf32>
    %65 = arith.mulf %60, %64 : vector<16x8xf32>
    %66 = arith.truncf %65 : vector<16x8xf32> to vector<16x8xbf16>
    %cst_75 = arith.constant dense<0.000000e+00> : vector<16x32xf32>
    %67 = tpu.matmul %66, %52, %cst_75 {dimension_numbers = #tpu.dot_dimension_numbers<[1], [0], [0], [1], [0, 0, 1, 1], [], []>} : vector<16x8xbf16>, vector<8x32xbf16>, vector<16x32xf32> -> vector<16x32xf32>
    %68 = vector.extract_strided_slice %42 {offsets = [16, 0], sizes = [16, 32], strides = [1, 1]} : vector<32x32xbf16> to vector<16x32xbf16>
    %69 = vector.extract_strided_slice %47 {offsets = [8, 0], sizes = [8, 32], strides = [1, 1]} : vector<16x32xbf16> to vector<8x32xbf16>
    %70 = vector.extract_strided_slice %49 {offsets = [8, 0], sizes = [8, 32], strides = [1, 1]} : vector<16x32xbf16> to vector<8x32xbf16>
    %cst_76 = arith.constant dense<0.000000e+00> : vector<16x8xf32>
    %71 = tpu.matmul %68, %69, %cst_76 {dimension_numbers = #tpu.dot_dimension_numbers<[1], [1], [0], [0], [0, 0, 1, 0], [], []>} : vector<16x32xbf16>, vector<8x32xbf16>, vector<16x8xf32> -> vector<16x8xf32>
    %cst_77 = arith.constant 0.176776692 : f32
    %72 = vector.broadcast %cst_77 : f32 to vector<16x8xf32>
    %73 = arith.mulf %71, %72 : vector<16x8xf32>
    %cst_78 = arith.constant dense<0xFF800000> : vector<16xf32>
    %74 = vector.multi_reduction <maximumf>, %73, %cst_78 [1] : vector<16x8xf32> to vector<16xf32>
    %75 = vector.shape_cast %74 : vector<16xf32> to vector<16x1xf32>
    %76 = vector.broadcast %75 : vector<16x1xf32> to vector<16x8xf32>
    %77 = arith.subf %73, %76 : vector<16x8xf32>
    %78 = math.exp %77 : vector<16x8xf32>
    %cst_79 = arith.constant dense<0.000000e+00> : vector<16xf32>
    %79 = vector.multi_reduction <add>, %78, %cst_79 [1] : vector<16x8xf32> to vector<16xf32>
    %80 = vector.shape_cast %79 : vector<16xf32> to vector<16x1xf32>
    %81 = tpu.reciprocal %80 {approx = true} : vector<16x1xf32> -> vector<16x1xf32>
    %82 = vector.broadcast %81 : vector<16x1xf32> to vector<16x8xf32>
    %83 = arith.mulf %78, %82 : vector<16x8xf32>
    %84 = arith.truncf %83 : vector<16x8xf32> to vector<16x8xbf16>
    %cst_80 = arith.constant dense<0.000000e+00> : vector<16x32xf32>
    %85 = tpu.matmul %84, %70, %cst_80 {dimension_numbers = #tpu.dot_dimension_numbers<[1], [0], [0], [1], [0, 0, 1, 1], [], []>} : vector<16x8xbf16>, vector<8x32xbf16>, vector<16x32xf32> -> vector<16x32xf32>
    %86 = tpu.concatenate %67, %85 in 0 : vector<16x32xf32>, vector<16x32xf32> -> vector<32x32xf32>
    %87 = arith.truncf %86 : vector<32x32xf32> to vector<32x32xbf16>
    %cst_81 = arith.constant dense<0.000000e+00> : vector<32x32xf32>
    %88 = tpu.matmul %87, %6, %cst_81 {dimension_numbers = #tpu.dot_dimension_numbers<[1], [0], [0], [1], [0, 0, 1, 1], [], []>} : vector<32x32xbf16>, vector<32x32xbf16>, vector<32x32xf32> -> vector<32x32xf32>
    %89 = vector.broadcast %7 : vector<1x32xf32> to vector<32x32xf32>
    %90 = arith.addf %88, %89 : vector<32x32xf32>
    %91 = arith.addf %37, %90 : vector<32x32xf32>
    %92 = arith.truncf %91 : vector<32x32xf32> to vector<32x32xbf16>
    %cst_82 = arith.constant dense<0.000000e+00> : vector<16x32xf32>
    %93 = tpu.matmul %33, %8, %cst_82 {dimension_numbers = #tpu.dot_dimension_numbers<[1], [0], [0], [1], [0, 0, 1, 1], [], []>} : vector<16x32xbf16>, vector<32x32xbf16>, vector<16x32xf32> -> vector<16x32xf32>
    %94 = vector.broadcast %9 : vector<1x32xf32> to vector<16x32xf32>
    %95 = arith.addf %93, %94 : vector<16x32xf32>
    %96 = arith.truncf %95 : vector<16x32xf32> to vector<16x32xbf16>
    %cst_83 = arith.constant dense<0.000000e+00> : vector<32x64xf32>
    %97 = tpu.matmul %92, %10, %cst_83 {dimension_numbers = #tpu.dot_dimension_numbers<[1], [0], [0], [1], [0, 0, 1, 1], [], []>} : vector<32x32xbf16>, vector<32x64xbf16>, vector<32x64xf32> -> vector<32x64xf32>
    %98 = vector.broadcast %11 : vector<1x64xf32> to vector<32x64xf32>
    %99 = arith.addf %97, %98 : vector<32x64xf32>
    %100 = vector.extract_strided_slice %99 {offsets = [0, 0], sizes = [32, 32], strides = [1, 1]} : vector<32x64xf32> to vector<32x32xf32>
    %101 = arith.truncf %100 : vector<32x32xf32> to vector<32x32xbf16>
    %102 = vector.extract_strided_slice %99 {offsets = [0, 32], sizes = [32, 32], strides = [1, 1]} : vector<32x64xf32> to vector<32x32xf32>
    %103 = arith.truncf %102 : vector<32x32xf32> to vector<32x32xbf16>
    %104 = vector.extract_strided_slice %96 {offsets = [0, 0], sizes = [8, 32], strides = [1, 1]} : vector<16x32xbf16> to vector<8x32xbf16>
    %105 = vector.extract_strided_slice %101 {offsets = [0, 0], sizes = [16, 32], strides = [1, 1]} : vector<32x32xbf16> to vector<16x32xbf16>
    %106 = vector.extract_strided_slice %103 {offsets = [0, 0], sizes = [16, 32], strides = [1, 1]} : vector<32x32xbf16> to vector<16x32xbf16>
    %cst_84 = arith.constant dense<0.000000e+00> : vector<8x16xf32>
    %107 = tpu.matmul %104, %105, %cst_84 {dimension_numbers = #tpu.dot_dimension_numbers<[1], [1], [0], [0], [0, 0, 1, 0], [], []>} : vector<8x32xbf16>, vector<16x32xbf16>, vector<8x16xf32> -> vector<8x16xf32>
    %cst_85 = arith.constant 0.176776692 : f32
    %108 = vector.broadcast %cst_85 : f32 to vector<8x16xf32>
    %109 = arith.mulf %107, %108 : vector<8x16xf32>
    %cst_86 = arith.constant dense<0xFF800000> : vector<8xf32>
    %110 = vector.multi_reduction <maximumf>, %109, %cst_86 [1] : vector<8x16xf32> to vector<8xf32>
    %111 = vector.shape_cast %110 : vector<8xf32> to vector<8x1xf32>
    %112 = vector.broadcast %111 : vector<8x1xf32> to vector<8x16xf32>
    %113 = arith.subf %109, %112 : vector<8x16xf32>
    %114 = math.exp %113 : vector<8x16xf32>
    %cst_87 = arith.constant dense<0.000000e+00> : vector<8xf32>
    %115 = vector.multi_reduction <add>, %114, %cst_87 [1] : vector<8x16xf32> to vector<8xf32>
    %116 = vector.shape_cast %115 : vector<8xf32> to vector<8x1xf32>
    %117 = tpu.reciprocal %116 {approx = true} : vector<8x1xf32> -> vector<8x1xf32>
    %118 = vector.broadcast %117 : vector<8x1xf32> to vector<8x16xf32>
    %119 = arith.mulf %114, %118 : vector<8x16xf32>
    %120 = arith.truncf %119 : vector<8x16xf32> to vector<8x16xbf16>
    %cst_88 = arith.constant dense<0.000000e+00> : vector<8x32xf32>
    %121 = tpu.matmul %120, %106, %cst_88 {dimension_numbers = #tpu.dot_dimension_numbers<[1], [0], [0], [1], [0, 0, 1, 1], [], []>} : vector<8x16xbf16>, vector<16x32xbf16>, vector<8x32xf32> -> vector<8x32xf32>
    %122 = vector.extract_strided_slice %96 {offsets = [8, 0], sizes = [8, 32], strides = [1, 1]} : vector<16x32xbf16> to vector<8x32xbf16>
    %123 = vector.extract_strided_slice %101 {offsets = [16, 0], sizes = [16, 32], strides = [1, 1]} : vector<32x32xbf16> to vector<16x32xbf16>
    %124 = vector.extract_strided_slice %103 {offsets = [16, 0], sizes = [16, 32], strides = [1, 1]} : vector<32x32xbf16> to vector<16x32xbf16>
    %cst_89 = arith.constant dense<0.000000e+00> : vector<8x16xf32>
    %125 = tpu.matmul %122, %123, %cst_89 {dimension_numbers = #tpu.dot_dimension_numbers<[1], [1], [0], [0], [0, 0, 1, 0], [], []>} : vector<8x32xbf16>, vector<16x32xbf16>, vector<8x16xf32> -> vector<8x16xf32>
    %cst_90 = arith.constant 0.176776692 : f32
    %126 = vector.broadcast %cst_90 : f32 to vector<8x16xf32>
    %127 = arith.mulf %125, %126 : vector<8x16xf32>
    %cst_91 = arith.constant dense<0xFF800000> : vector<8xf32>
    %128 = vector.multi_reduction <maximumf>, %127, %cst_91 [1] : vector<8x16xf32> to vector<8xf32>
    %129 = vector.shape_cast %128 : vector<8xf32> to vector<8x1xf32>
    %130 = vector.broadcast %129 : vector<8x1xf32> to vector<8x16xf32>
    %131 = arith.subf %127, %130 : vector<8x16xf32>
    %132 = math.exp %131 : vector<8x16xf32>
    %cst_92 = arith.constant dense<0.000000e+00> : vector<8xf32>
    %133 = vector.multi_reduction <add>, %132, %cst_92 [1] : vector<8x16xf32> to vector<8xf32>
    %134 = vector.shape_cast %133 : vector<8xf32> to vector<8x1xf32>
    %135 = tpu.reciprocal %134 {approx = true} : vector<8x1xf32> -> vector<8x1xf32>
    %136 = vector.broadcast %135 : vector<8x1xf32> to vector<8x16xf32>
    %137 = arith.mulf %132, %136 : vector<8x16xf32>
    %138 = arith.truncf %137 : vector<8x16xf32> to vector<8x16xbf16>
    %cst_93 = arith.constant dense<0.000000e+00> : vector<8x32xf32>
    %139 = tpu.matmul %138, %124, %cst_93 {dimension_numbers = #tpu.dot_dimension_numbers<[1], [0], [0], [1], [0, 0, 1, 1], [], []>} : vector<8x16xbf16>, vector<16x32xbf16>, vector<8x32xf32> -> vector<8x32xf32>
    %140 = tpu.concatenate %121, %139 in 0 : vector<8x32xf32>, vector<8x32xf32> -> vector<16x32xf32>
    %141 = arith.extf %33 : vector<16x32xbf16> to vector<16x32xf32>
    %142 = arith.truncf %140 : vector<16x32xf32> to vector<16x32xbf16>
    %cst_94 = arith.constant dense<0.000000e+00> : vector<16x32xf32>
    %143 = tpu.matmul %142, %12, %cst_94 {dimension_numbers = #tpu.dot_dimension_numbers<[1], [0], [0], [1], [0, 0, 1, 1], [], []>} : vector<16x32xbf16>, vector<32x32xbf16>, vector<16x32xf32> -> vector<16x32xf32>
    %144 = vector.broadcast %13 : vector<1x32xf32> to vector<16x32xf32>
    %145 = arith.addf %143, %144 : vector<16x32xf32>
    %146 = arith.addf %141, %145 : vector<16x32xf32>
    %147 = arith.truncf %146 : vector<16x32xf32> to vector<16x32xbf16>
    %cst_95 = arith.constant dense<0.000000e+00> : vector<16x64xf32>
    %148 = tpu.matmul %147, %14, %cst_95 {dimension_numbers = #tpu.dot_dimension_numbers<[1], [0], [0], [1], [0, 0, 1, 1], [], []>} : vector<16x32xbf16>, vector<32x64xbf16>, vector<16x64xf32> -> vector<16x64xf32>
    %149 = vector.broadcast %15 : vector<1x64xf32> to vector<16x64xf32>
    %150 = arith.addf %148, %149 : vector<16x64xf32>
    %151 = tpu.concatenate %147, %38 in 0 : vector<16x32xbf16>, vector<32x32xbf16> -> vector<48x32xbf16>
    %cst_96 = arith.constant dense<0.000000e+00> : vector<48x96xf32>
    %152 = tpu.matmul %151, %16, %cst_96 {dimension_numbers = #tpu.dot_dimension_numbers<[1], [0], [0], [1], [0, 0, 1, 1], [], []>} : vector<48x32xbf16>, vector<32x96xbf16>, vector<48x96xf32> -> vector<48x96xf32>
    %153 = vector.broadcast %17 : vector<1x96xf32> to vector<48x96xf32>
    %154 = arith.addf %152, %153 : vector<48x96xf32>
    %155 = vector.extract_strided_slice %154 {offsets = [0, 0], sizes = [16, 32], strides = [1, 1]} : vector<48x96xf32> to vector<16x32xf32>
    %156 = arith.truncf %155 : vector<16x32xf32> to vector<16x32xbf16>
    %157 = vector.extract_strided_slice %154 {offsets = [0, 32], sizes = [16, 32], strides = [1, 1]} : vector<48x96xf32> to vector<16x32xf32>
    %158 = arith.truncf %157 : vector<16x32xf32> to vector<16x32xbf16>
    %159 = vector.extract_strided_slice %154 {offsets = [0, 64], sizes = [16, 32], strides = [1, 1]} : vector<48x96xf32> to vector<16x32xf32>
    %160 = arith.truncf %159 : vector<16x32xf32> to vector<16x32xbf16>
    %161 = vector.extract_strided_slice %154 {offsets = [16, 0], sizes = [32, 32], strides = [1, 1]} : vector<48x96xf32> to vector<32x32xf32>
    %162 = arith.truncf %161 : vector<32x32xf32> to vector<32x32xbf16>
    %163 = vector.extract_strided_slice %154 {offsets = [16, 32], sizes = [32, 32], strides = [1, 1]} : vector<48x96xf32> to vector<32x32xf32>
    %164 = arith.truncf %163 : vector<32x32xf32> to vector<32x32xbf16>
    %165 = vector.extract_strided_slice %154 {offsets = [16, 64], sizes = [32, 32], strides = [1, 1]} : vector<48x96xf32> to vector<32x32xf32>
    %166 = arith.truncf %165 : vector<32x32xf32> to vector<32x32xbf16>
    %167 = vector.extract_strided_slice %156 {offsets = [0, 0], sizes = [8, 32], strides = [1, 1]} : vector<16x32xbf16> to vector<8x32xbf16>
    %168 = vector.extract_strided_slice %164 {offsets = [0, 0], sizes = [16, 32], strides = [1, 1]} : vector<32x32xbf16> to vector<16x32xbf16>
    %169 = vector.extract_strided_slice %166 {offsets = [0, 0], sizes = [16, 32], strides = [1, 1]} : vector<32x32xbf16> to vector<16x32xbf16>
    %cst_97 = arith.constant dense<0.000000e+00> : vector<8x16xf32>
    %170 = tpu.matmul %167, %168, %cst_97 {dimension_numbers = #tpu.dot_dimension_numbers<[1], [1], [0], [0], [0, 0, 1, 0], [], []>} : vector<8x32xbf16>, vector<16x32xbf16>, vector<8x16xf32> -> vector<8x16xf32>
    %cst_98 = arith.constant 0.176776692 : f32
    %171 = vector.broadcast %cst_98 : f32 to vector<8x16xf32>
    %172 = arith.mulf %170, %171 : vector<8x16xf32>
    %cst_99 = arith.constant dense<0xFF800000> : vector<8xf32>
    %173 = vector.multi_reduction <maximumf>, %172, %cst_99 [1] : vector<8x16xf32> to vector<8xf32>
    %174 = vector.shape_cast %173 : vector<8xf32> to vector<8x1xf32>
    %175 = vector.broadcast %174 : vector<8x1xf32> to vector<8x16xf32>
    %176 = arith.subf %172, %175 : vector<8x16xf32>
    %177 = math.exp %176 : vector<8x16xf32>
    %cst_100 = arith.constant dense<0.000000e+00> : vector<8xf32>
    %178 = vector.multi_reduction <add>, %177, %cst_100 [1] : vector<8x16xf32> to vector<8xf32>
    %179 = vector.shape_cast %178 : vector<8xf32> to vector<8x1xf32>
    %180 = tpu.reciprocal %179 {approx = true} : vector<8x1xf32> -> vector<8x1xf32>
    %181 = vector.broadcast %180 : vector<8x1xf32> to vector<8x16xf32>
    %182 = arith.mulf %177, %181 : vector<8x16xf32>
    %183 = arith.truncf %182 : vector<8x16xf32> to vector<8x16xbf16>
    %cst_101 = arith.constant dense<0.000000e+00> : vector<8x32xf32>
    %184 = tpu.matmul %183, %169, %cst_101 {dimension_numbers = #tpu.dot_dimension_numbers<[1], [0], [0], [1], [0, 0, 1, 1], [], []>} : vector<8x16xbf16>, vector<16x32xbf16>, vector<8x32xf32> -> vector<8x32xf32>
    %185 = vector.extract_strided_slice %156 {offsets = [8, 0], sizes = [8, 32], strides = [1, 1]} : vector<16x32xbf16> to vector<8x32xbf16>
    %186 = vector.extract_strided_slice %164 {offsets = [16, 0], sizes = [16, 32], strides = [1, 1]} : vector<32x32xbf16> to vector<16x32xbf16>
    %187 = vector.extract_strided_slice %166 {offsets = [16, 0], sizes = [16, 32], strides = [1, 1]} : vector<32x32xbf16> to vector<16x32xbf16>
    %cst_102 = arith.constant dense<0.000000e+00> : vector<8x16xf32>
    %188 = tpu.matmul %185, %186, %cst_102 {dimension_numbers = #tpu.dot_dimension_numbers<[1], [1], [0], [0], [0, 0, 1, 0], [], []>} : vector<8x32xbf16>, vector<16x32xbf16>, vector<8x16xf32> -> vector<8x16xf32>
    %cst_103 = arith.constant 0.176776692 : f32
    %189 = vector.broadcast %cst_103 : f32 to vector<8x16xf32>
    %190 = arith.mulf %188, %189 : vector<8x16xf32>
    %cst_104 = arith.constant dense<0xFF800000> : vector<8xf32>
    %191 = vector.multi_reduction <maximumf>, %190, %cst_104 [1] : vector<8x16xf32> to vector<8xf32>
    %192 = vector.shape_cast %191 : vector<8xf32> to vector<8x1xf32>
    %193 = vector.broadcast %192 : vector<8x1xf32> to vector<8x16xf32>
    %194 = arith.subf %190, %193 : vector<8x16xf32>
    %195 = math.exp %194 : vector<8x16xf32>
    %cst_105 = arith.constant dense<0.000000e+00> : vector<8xf32>
    %196 = vector.multi_reduction <add>, %195, %cst_105 [1] : vector<8x16xf32> to vector<8xf32>
    %197 = vector.shape_cast %196 : vector<8xf32> to vector<8x1xf32>
    %198 = tpu.reciprocal %197 {approx = true} : vector<8x1xf32> -> vector<8x1xf32>
    %199 = vector.broadcast %198 : vector<8x1xf32> to vector<8x16xf32>
    %200 = arith.mulf %195, %199 : vector<8x16xf32>
    %201 = arith.truncf %200 : vector<8x16xf32> to vector<8x16xbf16>
    %cst_106 = arith.constant dense<0.000000e+00> : vector<8x32xf32>
    %202 = tpu.matmul %201, %187, %cst_106 {dimension_numbers = #tpu.dot_dimension_numbers<[1], [0], [0], [1], [0, 0, 1, 1], [], []>} : vector<8x16xbf16>, vector<16x32xbf16>, vector<8x32xf32> -> vector<8x32xf32>
    %203 = tpu.concatenate %184, %202 in 0 : vector<8x32xf32>, vector<8x32xf32> -> vector<16x32xf32>
    %204 = vector.extract_strided_slice %162 {offsets = [0, 0], sizes = [16, 32], strides = [1, 1]} : vector<32x32xbf16> to vector<16x32xbf16>
    %205 = vector.extract_strided_slice %158 {offsets = [0, 0], sizes = [8, 32], strides = [1, 1]} : vector<16x32xbf16> to vector<8x32xbf16>
    %206 = vector.extract_strided_slice %160 {offsets = [0, 0], sizes = [8, 32], strides = [1, 1]} : vector<16x32xbf16> to vector<8x32xbf16>
    %cst_107 = arith.constant dense<0.000000e+00> : vector<16x8xf32>
    %207 = tpu.matmul %204, %205, %cst_107 {dimension_numbers = #tpu.dot_dimension_numbers<[1], [1], [0], [0], [0, 0, 1, 0], [], []>} : vector<16x32xbf16>, vector<8x32xbf16>, vector<16x8xf32> -> vector<16x8xf32>
    %cst_108 = arith.constant 0.176776692 : f32
    %208 = vector.broadcast %cst_108 : f32 to vector<16x8xf32>
    %209 = arith.mulf %207, %208 : vector<16x8xf32>
    %cst_109 = arith.constant dense<0xFF800000> : vector<16xf32>
    %210 = vector.multi_reduction <maximumf>, %209, %cst_109 [1] : vector<16x8xf32> to vector<16xf32>
    %211 = vector.shape_cast %210 : vector<16xf32> to vector<16x1xf32>
    %212 = vector.broadcast %211 : vector<16x1xf32> to vector<16x8xf32>
    %213 = arith.subf %209, %212 : vector<16x8xf32>
    %214 = math.exp %213 : vector<16x8xf32>
    %cst_110 = arith.constant dense<0.000000e+00> : vector<16xf32>
    %215 = vector.multi_reduction <add>, %214, %cst_110 [1] : vector<16x8xf32> to vector<16xf32>
    %216 = vector.shape_cast %215 : vector<16xf32> to vector<16x1xf32>
    %217 = tpu.reciprocal %216 {approx = true} : vector<16x1xf32> -> vector<16x1xf32>
    %218 = vector.broadcast %217 : vector<16x1xf32> to vector<16x8xf32>
    %219 = arith.mulf %214, %218 : vector<16x8xf32>
    %220 = arith.truncf %219 : vector<16x8xf32> to vector<16x8xbf16>
    %cst_111 = arith.constant dense<0.000000e+00> : vector<16x32xf32>
    %221 = tpu.matmul %220, %206, %cst_111 {dimension_numbers = #tpu.dot_dimension_numbers<[1], [0], [0], [1], [0, 0, 1, 1], [], []>} : vector<16x8xbf16>, vector<8x32xbf16>, vector<16x32xf32> -> vector<16x32xf32>
    %222 = vector.extract_strided_slice %162 {offsets = [16, 0], sizes = [16, 32], strides = [1, 1]} : vector<32x32xbf16> to vector<16x32xbf16>
    %223 = vector.extract_strided_slice %158 {offsets = [8, 0], sizes = [8, 32], strides = [1, 1]} : vector<16x32xbf16> to vector<8x32xbf16>
    %224 = vector.extract_strided_slice %160 {offsets = [8, 0], sizes = [8, 32], strides = [1, 1]} : vector<16x32xbf16> to vector<8x32xbf16>
    %cst_112 = arith.constant dense<0.000000e+00> : vector<16x8xf32>
    %225 = tpu.matmul %222, %223, %cst_112 {dimension_numbers = #tpu.dot_dimension_numbers<[1], [1], [0], [0], [0, 0, 1, 0], [], []>} : vector<16x32xbf16>, vector<8x32xbf16>, vector<16x8xf32> -> vector<16x8xf32>
    %cst_113 = arith.constant 0.176776692 : f32
    %226 = vector.broadcast %cst_113 : f32 to vector<16x8xf32>
    %227 = arith.mulf %225, %226 : vector<16x8xf32>
    %cst_114 = arith.constant dense<0xFF800000> : vector<16xf32>
    %228 = vector.multi_reduction <maximumf>, %227, %cst_114 [1] : vector<16x8xf32> to vector<16xf32>
    %229 = vector.shape_cast %228 : vector<16xf32> to vector<16x1xf32>
    %230 = vector.broadcast %229 : vector<16x1xf32> to vector<16x8xf32>
    %231 = arith.subf %227, %230 : vector<16x8xf32>
    %232 = math.exp %231 : vector<16x8xf32>
    %cst_115 = arith.constant dense<0.000000e+00> : vector<16xf32>
    %233 = vector.multi_reduction <add>, %232, %cst_115 [1] : vector<16x8xf32> to vector<16xf32>
    %234 = vector.shape_cast %233 : vector<16xf32> to vector<16x1xf32>
    %235 = tpu.reciprocal %234 {approx = true} : vector<16x1xf32> -> vector<16x1xf32>
    %236 = vector.broadcast %235 : vector<16x1xf32> to vector<16x8xf32>
    %237 = arith.mulf %232, %236 : vector<16x8xf32>
    %238 = arith.truncf %237 : vector<16x8xf32> to vector<16x8xbf16>
    %cst_116 = arith.constant dense<0.000000e+00> : vector<16x32xf32>
    %239 = tpu.matmul %238, %224, %cst_116 {dimension_numbers = #tpu.dot_dimension_numbers<[1], [0], [0], [1], [0, 0, 1, 1], [], []>} : vector<16x8xbf16>, vector<8x32xbf16>, vector<16x32xf32> -> vector<16x32xf32>
    %240 = tpu.concatenate %221, %239 in 0 : vector<16x32xf32>, vector<16x32xf32> -> vector<32x32xf32>
    %241 = arith.truncf %240 : vector<32x32xf32> to vector<32x32xbf16>
    %242 = arith.truncf %203 : vector<16x32xf32> to vector<16x32xbf16>
    %243 = tpu.concatenate %241, %242, %147 in 0 : vector<32x32xbf16>, vector<16x32xbf16>, vector<16x32xbf16> -> vector<64x32xbf16>
    %cst_117 = arith.constant dense<0.000000e+00> : vector<64x64xf32>
    %244 = tpu.matmul %243, %20, %cst_117 {dimension_numbers = #tpu.dot_dimension_numbers<[1], [0], [0], [1], [0, 0, 1, 1], [], []>} : vector<64x32xbf16>, vector<32x64xbf16>, vector<64x64xf32> -> vector<64x64xf32>
    %245 = vector.broadcast %21 : vector<1x64xf32> to vector<64x64xf32>
    %246 = arith.addf %244, %245 : vector<64x64xf32>
    %247 = vector.extract_strided_slice %246 {offsets = [0, 0], sizes = [32, 64], strides = [1, 1]} : vector<64x64xf32> to vector<32x64xf32>
    %248 = vector.extract_strided_slice %246 {offsets = [32, 0], sizes = [16, 64], strides = [1, 1]} : vector<64x64xf32> to vector<16x64xf32>
    %249 = vector.extract_strided_slice %246 {offsets = [48, 0], sizes = [16, 64], strides = [1, 1]} : vector<64x64xf32> to vector<16x64xf32>
    %250 = vector.extract_strided_slice %247 {offsets = [0, 0], sizes = [32, 32], strides = [1, 1]} : vector<32x64xf32> to vector<32x32xf32>
    %251 = arith.truncf %250 : vector<32x32xf32> to vector<32x32xbf16>
    %252 = vector.extract_strided_slice %247 {offsets = [0, 32], sizes = [32, 32], strides = [1, 1]} : vector<32x64xf32> to vector<32x32xf32>
    %253 = arith.truncf %252 : vector<32x32xf32> to vector<32x32xbf16>
    %254 = vector.extract_strided_slice %248 {offsets = [0, 0], sizes = [16, 32], strides = [1, 1]} : vector<16x64xf32> to vector<16x32xf32>
    %255 = arith.truncf %254 : vector<16x32xf32> to vector<16x32xbf16>
    %256 = vector.extract_strided_slice %248 {offsets = [0, 32], sizes = [16, 32], strides = [1, 1]} : vector<16x64xf32> to vector<16x32xf32>
    %257 = arith.truncf %256 : vector<16x32xf32> to vector<16x32xbf16>
    %258 = vector.extract_strided_slice %249 {offsets = [0, 0], sizes = [16, 32], strides = [1, 1]} : vector<16x64xf32> to vector<16x32xf32>
    %259 = arith.truncf %258 : vector<16x32xf32> to vector<16x32xbf16>
    %260 = vector.extract_strided_slice %249 {offsets = [0, 32], sizes = [16, 32], strides = [1, 1]} : vector<16x64xf32> to vector<16x32xf32>
    %261 = arith.truncf %260 : vector<16x32xf32> to vector<16x32xbf16>
    %cst_118 = arith.constant dense<0.000000e+00> : vector<16x32xf32>
    %262 = tpu.matmul %34, %18, %cst_118 {dimension_numbers = #tpu.dot_dimension_numbers<[1], [0], [0], [1], [0, 0, 1, 1], [], []>} : vector<16x32xbf16>, vector<32x32xbf16>, vector<16x32xf32> -> vector<16x32xf32>
    %263 = vector.broadcast %19 : vector<1x32xf32> to vector<16x32xf32>
    %264 = arith.addf %262, %263 : vector<16x32xf32>
    %265 = arith.truncf %264 : vector<16x32xf32> to vector<16x32xbf16>
    %266 = vector.extract_strided_slice %265 {offsets = [0, 0], sizes = [8, 32], strides = [1, 1]} : vector<16x32xbf16> to vector<8x32xbf16>
    %267 = vector.extract_strided_slice %251 {offsets = [0, 0], sizes = [16, 32], strides = [1, 1]} : vector<32x32xbf16> to vector<16x32xbf16>
    %268 = vector.extract_strided_slice %255 {offsets = [0, 0], sizes = [8, 32], strides = [1, 1]} : vector<16x32xbf16> to vector<8x32xbf16>
    %269 = vector.extract_strided_slice %259 {offsets = [0, 0], sizes = [8, 32], strides = [1, 1]} : vector<16x32xbf16> to vector<8x32xbf16>
    %270 = tpu.concatenate %267, %268, %269 in 0 : vector<16x32xbf16>, vector<8x32xbf16>, vector<8x32xbf16> -> vector<32x32xbf16>
    %271 = vector.extract_strided_slice %253 {offsets = [0, 0], sizes = [16, 32], strides = [1, 1]} : vector<32x32xbf16> to vector<16x32xbf16>
    %272 = vector.extract_strided_slice %257 {offsets = [0, 0], sizes = [8, 32], strides = [1, 1]} : vector<16x32xbf16> to vector<8x32xbf16>
    %273 = vector.extract_strided_slice %261 {offsets = [0, 0], sizes = [8, 32], strides = [1, 1]} : vector<16x32xbf16> to vector<8x32xbf16>
    %274 = tpu.concatenate %271, %272, %273 in 0 : vector<16x32xbf16>, vector<8x32xbf16>, vector<8x32xbf16> -> vector<32x32xbf16>
    %cst_119 = arith.constant dense<0.000000e+00> : vector<8x32xf32>
    %275 = tpu.matmul %266, %270, %cst_119 {dimension_numbers = #tpu.dot_dimension_numbers<[1], [1], [0], [0], [0, 0, 1, 0], [], []>} : vector<8x32xbf16>, vector<32x32xbf16>, vector<8x32xf32> -> vector<8x32xf32>
    %cst_120 = arith.constant 0.176776692 : f32
    %276 = vector.broadcast %cst_120 : f32 to vector<8x32xf32>
    %277 = arith.mulf %275, %276 : vector<8x32xf32>
    %cst_121 = arith.constant dense<0xFF800000> : vector<8xf32>
    %278 = vector.multi_reduction <maximumf>, %277, %cst_121 [1] : vector<8x32xf32> to vector<8xf32>
    %279 = vector.shape_cast %278 : vector<8xf32> to vector<8x1xf32>
    %280 = vector.broadcast %279 : vector<8x1xf32> to vector<8x32xf32>
    %281 = arith.subf %277, %280 : vector<8x32xf32>
    %282 = math.exp %281 : vector<8x32xf32>
    %cst_122 = arith.constant dense<0.000000e+00> : vector<8xf32>
    %283 = vector.multi_reduction <add>, %282, %cst_122 [1] : vector<8x32xf32> to vector<8xf32>
    %284 = vector.shape_cast %283 : vector<8xf32> to vector<8x1xf32>
    %285 = tpu.reciprocal %284 {approx = true} : vector<8x1xf32> -> vector<8x1xf32>
    %286 = vector.broadcast %285 : vector<8x1xf32> to vector<8x32xf32>
    %287 = arith.mulf %282, %286 : vector<8x32xf32>
    %288 = arith.truncf %287 : vector<8x32xf32> to vector<8x32xbf16>
    %cst_123 = arith.constant dense<0.000000e+00> : vector<8x32xf32>
    %289 = tpu.matmul %288, %274, %cst_123 {dimension_numbers = #tpu.dot_dimension_numbers<[1], [0], [0], [1], [0, 0, 1, 1], [], []>} : vector<8x32xbf16>, vector<32x32xbf16>, vector<8x32xf32> -> vector<8x32xf32>
    %290 = vector.extract_strided_slice %265 {offsets = [8, 0], sizes = [8, 32], strides = [1, 1]} : vector<16x32xbf16> to vector<8x32xbf16>
    %291 = vector.extract_strided_slice %251 {offsets = [16, 0], sizes = [16, 32], strides = [1, 1]} : vector<32x32xbf16> to vector<16x32xbf16>
    %292 = vector.extract_strided_slice %255 {offsets = [8, 0], sizes = [8, 32], strides = [1, 1]} : vector<16x32xbf16> to vector<8x32xbf16>
    %293 = vector.extract_strided_slice %259 {offsets = [8, 0], sizes = [8, 32], strides = [1, 1]} : vector<16x32xbf16> to vector<8x32xbf16>
    %294 = tpu.concatenate %291, %292, %293 in 0 : vector<16x32xbf16>, vector<8x32xbf16>, vector<8x32xbf16> -> vector<32x32xbf16>
    %295 = vector.extract_strided_slice %253 {offsets = [16, 0], sizes = [16, 32], strides = [1, 1]} : vector<32x32xbf16> to vector<16x32xbf16>
    %296 = vector.extract_strided_slice %257 {offsets = [8, 0], sizes = [8, 32], strides = [1, 1]} : vector<16x32xbf16> to vector<8x32xbf16>
    %297 = vector.extract_strided_slice %261 {offsets = [8, 0], sizes = [8, 32], strides = [1, 1]} : vector<16x32xbf16> to vector<8x32xbf16>
    %298 = tpu.concatenate %295, %296, %297 in 0 : vector<16x32xbf16>, vector<8x32xbf16>, vector<8x32xbf16> -> vector<32x32xbf16>
    %cst_124 = arith.constant dense<0.000000e+00> : vector<8x32xf32>
    %299 = tpu.matmul %290, %294, %cst_124 {dimension_numbers = #tpu.dot_dimension_numbers<[1], [1], [0], [0], [0, 0, 1, 0], [], []>} : vector<8x32xbf16>, vector<32x32xbf16>, vector<8x32xf32> -> vector<8x32xf32>
    %cst_125 = arith.constant 0.176776692 : f32
    %300 = vector.broadcast %cst_125 : f32 to vector<8x32xf32>
    %301 = arith.mulf %299, %300 : vector<8x32xf32>
    %cst_126 = arith.constant dense<0xFF800000> : vector<8xf32>
    %302 = vector.multi_reduction <maximumf>, %301, %cst_126 [1] : vector<8x32xf32> to vector<8xf32>
    %303 = vector.shape_cast %302 : vector<8xf32> to vector<8x1xf32>
    %304 = vector.broadcast %303 : vector<8x1xf32> to vector<8x32xf32>
    %305 = arith.subf %301, %304 : vector<8x32xf32>
    %306 = math.exp %305 : vector<8x32xf32>
    %cst_127 = arith.constant dense<0.000000e+00> : vector<8xf32>
    %307 = vector.multi_reduction <add>, %306, %cst_127 [1] : vector<8x32xf32> to vector<8xf32>
    %308 = vector.shape_cast %307 : vector<8xf32> to vector<8x1xf32>
    %309 = tpu.reciprocal %308 {approx = true} : vector<8x1xf32> -> vector<8x1xf32>
    %310 = vector.broadcast %309 : vector<8x1xf32> to vector<8x32xf32>
    %311 = arith.mulf %306, %310 : vector<8x32xf32>
    %312 = arith.truncf %311 : vector<8x32xf32> to vector<8x32xbf16>
    %cst_128 = arith.constant dense<0.000000e+00> : vector<8x32xf32>
    %313 = tpu.matmul %312, %298, %cst_128 {dimension_numbers = #tpu.dot_dimension_numbers<[1], [0], [0], [1], [0, 0, 1, 1], [], []>} : vector<8x32xbf16>, vector<32x32xbf16>, vector<8x32xf32> -> vector<8x32xf32>
    %314 = tpu.concatenate %289, %313 in 0 : vector<8x32xf32>, vector<8x32xf32> -> vector<16x32xf32>
    %315 = arith.extf %34 : vector<16x32xbf16> to vector<16x32xf32>
    %316 = arith.truncf %314 : vector<16x32xf32> to vector<16x32xbf16>
    %cst_129 = arith.constant dense<0.000000e+00> : vector<16x32xf32>
    %317 = tpu.matmul %316, %22, %cst_129 {dimension_numbers = #tpu.dot_dimension_numbers<[1], [0], [0], [1], [0, 0, 1, 1], [], []>} : vector<16x32xbf16>, vector<32x32xbf16>, vector<16x32xf32> -> vector<16x32xf32>
    %318 = vector.broadcast %23 : vector<1x32xf32> to vector<16x32xf32>
    %319 = arith.addf %317, %318 : vector<16x32xf32>
    %320 = arith.addf %315, %319 : vector<16x32xf32>
    %321 = arith.truncf %320 : vector<16x32xf32> to vector<16x32xbf16>
    %cst_130 = arith.constant dense<0.000000e+00> : vector<16x64xf32>
    %322 = tpu.matmul %321, %24, %cst_130 {dimension_numbers = #tpu.dot_dimension_numbers<[1], [0], [0], [1], [0, 0, 1, 1], [], []>} : vector<16x32xbf16>, vector<32x64xbf16>, vector<16x64xf32> -> vector<16x64xf32>
    %323 = vector.broadcast %25 : vector<1x64xf32> to vector<16x64xf32>
    %324 = arith.addf %322, %323 : vector<16x64xf32>
    %325 = tpu.concatenate %150, %324 in 1 : vector<16x64xf32>, vector<16x64xf32> -> vector<16x128xf32>
    %c0_131 = arith.constant 0 : index
    %c0_132 = arith.constant 0 : index
    %326 = vector.load %arg36[%c0_131, %c0_132] : memref<16x128xf32, #tpu.memory_space<vmem>>, vector<16x128xf32>
    tpu.vector_store %arg36[%c0_131, %c0_132], %325 {strides = array<i32>} : memref<16x128xf32, #tpu.memory_space<vmem>>, vector<16x128xf32>,
    %327 = vector.extract_strided_slice %320 {offsets = [0, 0], sizes = [8, 32], strides = [1, 1]} : vector<16x32xf32> to vector<8x32xf32>
    %cst_133 = arith.constant dense<0.000000e+00> : vector<32xf32>
    %328 = vector.multi_reduction <add>, %327, %cst_133 [0] : vector<8x32xf32> to vector<32xf32>
    %329 = vector.shape_cast %328 : vector<32xf32> to vector<1x32xf32>
    %cst_134 = arith.constant 8.000000e+00 : f32
    %330 = vector.broadcast %cst_134 : f32 to vector<1x32xf32>
    %331 = arith.divf %329, %330 : vector<1x32xf32>
    %332 = vector.extract_strided_slice %320 {offsets = [8, 0], sizes = [8, 32], strides = [1, 1]} : vector<16x32xf32> to vector<8x32xf32>
    %cst_135 = arith.constant dense<0.000000e+00> : vector<32xf32>
    %333 = vector.multi_reduction <add>, %332, %cst_135 [0] : vector<8x32xf32> to vector<32xf32>
    %334 = vector.shape_cast %333 : vector<32xf32> to vector<1x32xf32>
    %cst_136 = arith.constant 8.000000e+00 : f32
    %335 = vector.broadcast %cst_136 : f32 to vector<1x32xf32>
    %336 = arith.divf %334, %335 : vector<1x32xf32>
    %337 = tpu.concatenate %331, %336 in 0 : vector<1x32xf32>, vector<1x32xf32> -> vector<2x32xf32>
    %338 = arith.truncf %337 : vector<2x32xf32> to vector<2x32xbf16>
    %cst_137 = arith.constant dense<0.000000e+00> : vector<2x128xf32>
    %339 = tpu.matmul %338, %26, %cst_137 {dimension_numbers = #tpu.dot_dimension_numbers<[1], [0], [0], [1], [0, 0, 1, 1], [], []>} : vector<2x32xbf16>, vector<32x128xbf16>, vector<2x128xf32> -> vector<2x128xf32>
    %340 = vector.broadcast %27 : vector<1x128xf32> to vector<2x128xf32>
    %341 = arith.addf %339, %340 : vector<2x128xf32>
    %c0_138 = arith.constant 0 : index
    %c0_139 = arith.constant 0 : index
    %342 = vector.load %arg37[%c0_138, %c0_139] : memref<2x128xf32, #tpu.memory_space<vmem>>, vector<2x128xf32>
    tpu.vector_store %arg37[%c0_138, %c0_139], %341 {strides = array<i32>} : memref<2x128xf32, #tpu.memory_space<vmem>>, vector<2x128xf32>,
    %343 = tpu.concatenate %150, %324 in 0 : vector<16x64xf32>, vector<16x64xf32> -> vector<32x64xf32>
    %cst_140 = arith.constant dense<0xFF800000> : vector<32xf32>
    %344 = vector.multi_reduction <maximumf>, %343, %cst_140 [1] : vector<32x64xf32> to vector<32xf32>
    %345 = vector.shape_cast %344 : vector<32xf32> to vector<32x1xf32>
    %346 = vector.broadcast %345 : vector<32x1xf32> to vector<32x64xf32>
    %347 = arith.subf %343, %346 : vector<32x64xf32>
    %348 = math.exp %347 : vector<32x64xf32>
    %cst_141 = arith.constant dense<0.000000e+00> : vector<32xf32>
    %349 = vector.multi_reduction <add>, %348, %cst_141 [1] : vector<32x64xf32> to vector<32xf32>
    %350 = vector.shape_cast %349 : vector<32xf32> to vector<32x1xf32>
    %351 = tpu.reciprocal %350 {approx = true} : vector<32x1xf32> -> vector<32x1xf32>
    %352 = vector.broadcast %351 : vector<32x1xf32> to vector<32x64xf32>
    %353 = arith.mulf %348, %352 : vector<32x64xf32>
    %354 = arith.truncf %353 : vector<32x64xf32> to vector<32x64xbf16>
    %cst_142 = arith.constant dense<0.000000e+00> : vector<32x32xf32>
    %355 = tpu.matmul %354, %28, %cst_142 {dimension_numbers = #tpu.dot_dimension_numbers<[1], [0], [0], [1], [0, 0, 1, 1], [], []>} : vector<32x64xbf16>, vector<64x32xbf16>, vector<32x32xf32> -> vector<32x32xf32>
    %356 = vector.extract_strided_slice %355 {offsets = [0, 0], sizes = [8, 32], strides = [1, 1]} : vector<32x32xf32> to vector<8x32xf32>
    %cst_143 = arith.constant dense<0.000000e+00> : vector<32xf32>
    %357 = vector.multi_reduction <add>, %356, %cst_143 [0] : vector<8x32xf32> to vector<32xf32>
    %358 = vector.shape_cast %357 : vector<32xf32> to vector<1x32xf32>
    %cst_144 = arith.constant 8.000000e+00 : f32
    %359 = vector.broadcast %cst_144 : f32 to vector<1x32xf32>
    %360 = arith.divf %358, %359 : vector<1x32xf32>
    %361 = vector.extract_strided_slice %355 {offsets = [8, 0], sizes = [8, 32], strides = [1, 1]} : vector<32x32xf32> to vector<8x32xf32>
    %cst_145 = arith.constant dense<0.000000e+00> : vector<32xf32>
    %362 = vector.multi_reduction <add>, %361, %cst_145 [0] : vector<8x32xf32> to vector<32xf32>
    %363 = vector.shape_cast %362 : vector<32xf32> to vector<1x32xf32>
    %cst_146 = arith.constant 8.000000e+00 : f32
    %364 = vector.broadcast %cst_146 : f32 to vector<1x32xf32>
    %365 = arith.divf %363, %364 : vector<1x32xf32>
    %366 = vector.extract_strided_slice %355 {offsets = [16, 0], sizes = [8, 32], strides = [1, 1]} : vector<32x32xf32> to vector<8x32xf32>
    %cst_147 = arith.constant dense<0.000000e+00> : vector<32xf32>
    %367 = vector.multi_reduction <add>, %366, %cst_147 [0] : vector<8x32xf32> to vector<32xf32>
    %368 = vector.shape_cast %367 : vector<32xf32> to vector<1x32xf32>
    %cst_148 = arith.constant 8.000000e+00 : f32
    %369 = vector.broadcast %cst_148 : f32 to vector<1x32xf32>
    %370 = arith.divf %368, %369 : vector<1x32xf32>
    %371 = vector.extract_strided_slice %355 {offsets = [24, 0], sizes = [8, 32], strides = [1, 1]} : vector<32x32xf32> to vector<8x32xf32>
    %cst_149 = arith.constant dense<0.000000e+00> : vector<32xf32>
    %372 = vector.multi_reduction <add>, %371, %cst_149 [0] : vector<8x32xf32> to vector<32xf32>
    %373 = vector.shape_cast %372 : vector<32xf32> to vector<1x32xf32>
    %cst_150 = arith.constant 8.000000e+00 : f32
    %374 = vector.broadcast %cst_150 : f32 to vector<1x32xf32>
    %375 = arith.divf %373, %374 : vector<1x32xf32>
    %376 = tpu.concatenate %360, %365, %370, %375 in 0 : vector<1x32xf32>, vector<1x32xf32>, vector<1x32xf32>, vector<1x32xf32> -> vector<4x32xf32>
    %377 = arith.truncf %376 : vector<4x32xf32> to vector<4x32xbf16>
    %cst_151 = arith.constant dense<0.000000e+00> : vector<4x128xf32>
    %378 = tpu.matmul %377, %29, %cst_151 {dimension_numbers = #tpu.dot_dimension_numbers<[1], [0], [0], [1], [0, 0, 1, 1], [], []>} : vector<4x32xbf16>, vector<32x128xbf16>, vector<4x128xf32> -> vector<4x128xf32>
    %379 = vector.broadcast %30 : vector<1x128xf32> to vector<4x128xf32>
    %380 = arith.addf %378, %379 : vector<4x128xf32>
    %c0_152 = arith.constant 0 : index
    %c0_153 = arith.constant 0 : index
    %381 = vector.load %arg38[%c0_152, %c0_153] : memref<4x128xf32, #tpu.memory_space<vmem>>, vector<4x128xf32>
    tpu.vector_store %arg38[%c0_152, %c0_153], %380 {strides = array<i32>} : memref<4x128xf32, #tpu.memory_space<vmem>>, vector<4x128xf32>,
    return
  }
  func.func @transform_0(%arg0: i32) -> (i32, i32) {
    %c0_i32 = arith.constant 0 : i32
    %c0_i32_0 = arith.constant 0 : i32
    %c0_i32_1 = arith.constant 0 : i32
    return %c0_i32, %c0_i32_0 : i32, i32
  }
  func.func @transform_1(%arg0: i32) -> (i32, i32) {
    %c0_i32 = arith.constant 0 : i32
    %c0_i32_0 = arith.constant 0 : i32
    %c0_i32_1 = arith.constant 0 : i32
    return %c0_i32, %c0_i32_0 : i32, i32
  }
  func.func @transform_2(%arg0: i32) -> (i32, i32) {
    %c0_i32 = arith.constant 0 : i32
    %c0_i32_0 = arith.constant 0 : i32
    %c0_i32_1 = arith.constant 0 : i32
    return %c0_i32, %c0_i32_0 : i32, i32
  }
  func.func @transform_3(%arg0: i32) -> (i32, i32) {
    %c0_i32 = arith.constant 0 : i32
    %c0_i32_0 = arith.constant 0 : i32
    %c0_i32_1 = arith.constant 0 : i32
    return %c0_i32, %c0_i32_0 : i32, i32
  }
  func.func @transform_4(%arg0: i32) -> (i32, i32) {
    %c0_i32 = arith.constant 0 : i32
    %c0_i32_0 = arith.constant 0 : i32
    %c0_i32_1 = arith.constant 0 : i32
    return %c0_i32, %c0_i32_0 : i32, i32
  }
  func.func @transform_5(%arg0: i32) -> (i32, i32) {
    %c0_i32 = arith.constant 0 : i32
    %c0_i32_0 = arith.constant 0 : i32
    %c0_i32_1 = arith.constant 0 : i32
    return %c0_i32, %c0_i32_0 : i32, i32
  }
  func.func @transform_6(%arg0: i32) -> (i32, i32) {
    %c0_i32 = arith.constant 0 : i32
    %c0_i32_0 = arith.constant 0 : i32
    %c0_i32_1 = arith.constant 0 : i32
    return %c0_i32, %c0_i32_0 : i32, i32
  }
  func.func @transform_7(%arg0: i32) -> (i32, i32) {
    %c0_i32 = arith.constant 0 : i32
    %c0_i32_0 = arith.constant 0 : i32
    %c0_i32_1 = arith.constant 0 : i32
    return %c0_i32, %c0_i32_0 : i32, i32
  }
  func.func @transform_8(%arg0: i32) -> (i32, i32) {
    %c0_i32 = arith.constant 0 : i32
    %c0_i32_0 = arith.constant 0 : i32
    %c0_i32_1 = arith.constant 0 : i32
    return %c0_i32, %c0_i32_0 : i32, i32
  }
  func.func @transform_9(%arg0: i32) -> (i32, i32) {
    %c0_i32 = arith.constant 0 : i32
    %c0_i32_0 = arith.constant 0 : i32
    %c0_i32_1 = arith.constant 0 : i32
    return %c0_i32, %c0_i32_0 : i32, i32
  }
  func.func @transform_10(%arg0: i32) -> (i32, i32) {
    %c0_i32 = arith.constant 0 : i32
    %c0_i32_0 = arith.constant 0 : i32
    %c0_i32_1 = arith.constant 0 : i32
    return %c0_i32, %c0_i32_0 : i32, i32
  }
  func.func @transform_11(%arg0: i32) -> (i32, i32) {
    %c0_i32 = arith.constant 0 : i32
    %c0_i32_0 = arith.constant 0 : i32
    %c0_i32_1 = arith.constant 0 : i32
    return %c0_i32, %c0_i32_0 : i32, i32
  }
  func.func @transform_12(%arg0: i32) -> (i32, i32) {
    %c0_i32 = arith.constant 0 : i32
    %c0_i32_0 = arith.constant 0 : i32
    %c0_i32_1 = arith.constant 0 : i32
    return %c0_i32, %c0_i32_0 : i32, i32
  }
  func.func @transform_13(%arg0: i32) -> (i32, i32) {
    %c0_i32 = arith.constant 0 : i32
    %c0_i32_0 = arith.constant 0 : i32
    %c0_i32_1 = arith.constant 0 : i32
    return %c0_i32, %c0_i32_0 : i32, i32
  }
  func.func @transform_14(%arg0: i32) -> (i32, i32) {
    %c0_i32 = arith.constant 0 : i32
    %c0_i32_0 = arith.constant 0 : i32
    %c0_i32_1 = arith.constant 0 : i32
    return %c0_i32, %c0_i32_0 : i32, i32
  }
  func.func @transform_15(%arg0: i32) -> (i32, i32) {
    %c0_i32 = arith.constant 0 : i32
    %c0_i32_0 = arith.constant 0 : i32
    %c0_i32_1 = arith.constant 0 : i32
    return %c0_i32, %c0_i32_0 : i32, i32
  }
  func.func @transform_16(%arg0: i32) -> (i32, i32) {
    %c0_i32 = arith.constant 0 : i32
    %c0_i32_0 = arith.constant 0 : i32
    %c0_i32_1 = arith.constant 0 : i32
    return %c0_i32, %c0_i32_0 : i32, i32
  }
  func.func @transform_17(%arg0: i32) -> (i32, i32) {
    %c0_i32 = arith.constant 0 : i32
    %c0_i32_0 = arith.constant 0 : i32
    %c0_i32_1 = arith.constant 0 : i32
    return %c0_i32, %c0_i32_0 : i32, i32
  }
  func.func @transform_18(%arg0: i32) -> (i32, i32) {
    %c0_i32 = arith.constant 0 : i32
    %c0_i32_0 = arith.constant 0 : i32
    %c0_i32_1 = arith.constant 0 : i32
    return %c0_i32, %c0_i32_0 : i32, i32
  }
  func.func @transform_19(%arg0: i32) -> (i32, i32) {
    %c0_i32 = arith.constant 0 : i32
    %c0_i32_0 = arith.constant 0 : i32
    %c0_i32_1 = arith.constant 0 : i32
    return %c0_i32, %c0_i32_0 : i32, i32
  }
  func.func @transform_20(%arg0: i32) -> (i32, i32) {
    %c0_i32 = arith.constant 0 : i32
    %c0_i32_0 = arith.constant 0 : i32
    %c0_i32_1 = arith.constant 0 : i32
    return %c0_i32, %c0_i32_0 : i32, i32
  }
  func.func @transform_21(%arg0: i32) -> (i32, i32) {
    %c0_i32 = arith.constant 0 : i32
    %c0_i32_0 = arith.constant 0 : i32
    %c0_i32_1 = arith.constant 0 : i32
    return %c0_i32, %c0_i32_0 : i32, i32
  }
  func.func @transform_22(%arg0: i32) -> (i32, i32) {
    %c0_i32 = arith.constant 0 : i32
    %c0_i32_0 = arith.constant 0 : i32
    %c0_i32_1 = arith.constant 0 : i32
    return %c0_i32, %c0_i32_0 : i32, i32
  }
  func.func @transform_23(%arg0: i32) -> (i32, i32) {
    %c0_i32 = arith.constant 0 : i32
    %c0_i32_0 = arith.constant 0 : i32
    %c0_i32_1 = arith.constant 0 : i32
    return %c0_i32, %c0_i32_0 : i32, i32
  }
  func.func @transform_24(%arg0: i32) -> (i32, i32) {
    %c0_i32 = arith.constant 0 : i32
    %c0_i32_0 = arith.constant 0 : i32
    %c0_i32_1 = arith.constant 0 : i32
    return %c0_i32, %c0_i32_0 : i32, i32
  }
  func.func @transform_25(%arg0: i32) -> (i32, i32) {
    %c0_i32 = arith.constant 0 : i32
    %c0_i32_0 = arith.constant 0 : i32
    %c0_i32_1 = arith.constant 0 : i32
    return %c0_i32, %c0_i32_0 : i32, i32
  }
  func.func @transform_26(%arg0: i32) -> (i32, i32) {
    %c0_i32 = arith.constant 0 : i32
    %c0_i32_0 = arith.constant 0 : i32
    %c0_i32_1 = arith.constant 0 : i32
    return %c0_i32, %c0_i32_0 : i32, i32
  }
  func.func @transform_27(%arg0: i32) -> (i32, i32) {
    %c0_i32 = arith.constant 0 : i32
    %c0_i32_0 = arith.constant 0 : i32
    %c0_i32_1 = arith.constant 0 : i32
    return %c0_i32, %c0_i32_0 : i32, i32
  }
  func.func @transform_28(%arg0: i32) -> (i32, i32) {
    %c0_i32 = arith.constant 0 : i32
    %c0_i32_0 = arith.constant 0 : i32
    %c0_i32_1 = arith.constant 0 : i32
    return %c0_i32, %c0_i32_0 : i32, i32
  }
  func.func @transform_29(%arg0: i32) -> (i32, i32) {
    %c0_i32 = arith.constant 0 : i32
    %c0_i32_0 = arith.constant 0 : i32
    %c0_i32_1 = arith.constant 0 : i32
    return %c0_i32, %c0_i32_0 : i32, i32
  }
  func.func @transform_30(%arg0: i32) -> (i32, i32) {
    %c0_i32 = arith.constant 0 : i32
    %c0_i32_0 = arith.constant 0 : i32
    %c0_i32_1 = arith.constant 0 : i32
    return %c0_i32, %c0_i32_0 : i32, i32
  }
  func.func @transform_31(%arg0: i32) -> (i32, i32) {
    %c0_i32 = arith.constant 0 : i32
    %c0_i32_0 = arith.constant 0 : i32
    %c0_i32_1 = arith.constant 0 : i32
    return %c0_i32, %c0_i32_0 : i32, i32
  }
  func.func @transform_32(%arg0: i32) -> (i32, i32) {
    %c0_i32 = arith.constant 0 : i32
    %c0_i32_0 = arith.constant 0 : i32
    %c0_i32_1 = arith.constant 0 : i32
    return %c0_i32, %c0_i32_0 : i32, i32
  }
  func.func @transform_33(%arg0: i32) -> (i32, i32) {
    %c0_i32 = arith.constant 0 : i32
    %c0_i32_0 = arith.constant 0 : i32
    %c0_i32_1 = arith.constant 0 : i32
    return %c0_i32, %c0_i32_0 : i32, i32
  }
  func.func @transform_34(%arg0: i32) -> (i32, i32) {
    %c0_i32 = arith.constant 0 : i32
    %c0_i32_0 = arith.constant 0 : i32
    %c0_i32_1 = arith.constant 0 : i32
    return %c0_i32, %c0_i32_0 : i32, i32
  }
  func.func @transform_35(%arg0: i32) -> (i32, i32) {
    %c0_i32 = arith.constant 0 : i32
    %c0_i32_0 = arith.constant 0 : i32
    %c0_i32_1 = arith.constant 0 : i32
    return %c0_i32, %c0_i32_0 : i32, i32
  }
  func.func @transform_36(%arg0: i32) -> (i32, i32) {
    %c0_i32 = arith.constant 0 : i32
    %c0_i32_0 = arith.constant 0 : i32
    %c0_i32_1 = arith.constant 0 : i32
    return %c0_i32, %c0_i32_0 : i32, i32
  }
  func.func @transform_37(%arg0: i32) -> (i32, i32) {
    %c0_i32 = arith.constant 0 : i32
    %c0_i32_0 = arith.constant 0 : i32
    %c0_i32_1 = arith.constant 0 : i32
    return %c0_i32, %c0_i32_0 : i32, i32
  }
}

</mosaic_0001>

<bundles_post_ra>
// kernel: _lambda_.1
= control target key start
LH: loop header
LB: loop body
LE: loop exit
PB: predicated region body
PF: predicated region fallthrough
CT: control target
= control target key end

     0   :  { %s2218_s6 = smov 1   ;;  %s2219_s10 = smov 2   ;;  %s2734_s0 = inlined_call_operand.smem [shape: u32[38], index: -1, kind: input, shape index: {}] }
   0x1   :  { %s2267_s5 = sld [smem:[%s2734_s0]]   ;;  %s2220_s14 = smov 3  }
   0x2   :  { %s2272_s9 = sld [smem:[%s2734_s0 + %s2218_s6]]   ;;  %s2221_s18 = smov 4  }
   0x3   :  { %s2277_s13 = sld [smem:[%s2734_s0 + %s2219_s10]]   ;;  %s2222_s22 = smov 5  }
   0x4   :  { %s2282_s17 = sld [smem:[%s2734_s0 + %s2220_s14]]   ;;  %s2223_s26 = smov 6  }
   0x5   :  { %s2287_s21 = sld [smem:[%s2734_s0 + %s2221_s18]]   ;;  %s2224_s30 = smov 7  }
   0x6   :  { %s2292_s25 = sld [smem:[%s2734_s0 + %s2222_s22]]   ;;  %s2225_s4 = smov 8  }
   0x7   :  { %s2297_s29 = sld [smem:[%s2734_s0 + %s2223_s26]]   ;;  %s2226_s10 = smov 9  }
   0x8   :  { %s2302_s3 = sld [smem:[%s2734_s0 + %s2224_s30]]   ;;  %s2227_s15 = smov 10  }
   0x9   :  { %s2307_s8 = sld [smem:[%s2734_s0 + %s2225_s4]]   ;;  %s2228_s20 = smov 11  }
   0xa   :  { %2746 = sst [smem:[#allocation5_spill]] %s2282_s17  ;;  %s2229_s26 = smov 12  }
   0xb   :  { %s2312_s14 = sld [smem:[%s2734_s0 + %s2226_s10]]   ;;  %s2230_s1 = smov 13  }
   0xc   :  { %s2317_s19 = sld [smem:[%s2734_s0 + %s2227_s15]]   ;;  %s2231_s7 = smov 14  }
   0xd   :  { %s2322_s24 = sld [smem:[%s2734_s0 + %s2228_s20]]   ;;  %s2232_s15 = smov 15  }
   0xe   :  { %s2327_s30 = sld [smem:[%s2734_s0 + %s2229_s26]]   ;;  %s2233_s22 = smov 16  }
   0xf   :  { %s2332_s6 = sld [smem:[%s2734_s0 + %s2230_s1]]   ;;  %s2234_s28 = smov 17  }
  0x10   :  { %s2337_s12 = sld [smem:[%s2734_s0 + %s2231_s7]]   ;;  %s2235_s7 = smov 18  }
  0x11   :  { %s2342_s20 = sld [smem:[%s2734_s0 + %s2232_s15]]   ;;  %s2236_s15 = smov 19  }
  0x12   :  { %s2347_s27 = sld [smem:[%s2734_s0 + %s2233_s22]]   ;;  %s2237_s22 = smov 20  }
  0x13   :  { %s2352_s4 = sld [smem:[%s2734_s0 + %s2234_s28]]   ;;  %s2238_s28 = smov 21  }
  0x14   :  { %s2357_s17 = sld [smem:[%s2734_s0 + %s2235_s7]]   ;;  %s2239_s7 = smov 22  }
  0x15   :  { %2747 = sst [smem:[#allocation6_spill]] %s2332_s6 }
  0x16   :  { %s2362_s6 = sld [smem:[%s2734_s0 + %s2236_s15]]   ;;  %s2240_s15 = smov 23  }
  0x18   :  { %2748 = sst [smem:[#allocation7_spill]] %s2347_s27 }
  0x19   :  { %2749 = sst [smem:[#allocation8_spill]] %s2352_s4 }
  0x1a   :  { %2750 = sst [smem:[#allocation9_spill]] %s2357_s17 }
  0x1b   :  { %s2367_s27 = sld [smem:[%s2734_s0 + %s2237_s22]]   ;;  %s2241_s22 = smov 24  }
  0x1c   :  { %2751 = sst [smem:[#allocation10_spill]] %s2362_s6 }
  0x1d   :  { %s2372_s4 = sld [smem:[%s2734_s0 + %s2238_s28]]   ;;  %s2242_s28 = smov 25  }
  0x1e   :  { %s2377_s17 = sld [smem:[%s2734_s0 + %s2239_s7]]   ;;  %s2243_s7 = smov 26  }
  0x1f   :  { %s2382_s6 = sld [smem:[%s2734_s0 + %s2240_s15]]   ;;  %s2244_s15 = smov 27  }
  0x21   :  { %2752 = sst [smem:[#allocation11_spill]] %s2367_s27 }
  0x22   :  { %s2387_s27 = sld [smem:[%s2734_s0 + %s2241_s22]]   ;;  %s2245_s22 = smov 28  }
  0x23   :  { %2753 = sst [smem:[#allocation12_spill]] %s2372_s4 }
  0x24   :  { %2754 = sst [smem:[#allocation13_spill]] %s2377_s17 }
  0x25   :  { %2755 = sst [smem:[#allocation14_spill]] %s2382_s6 }
  0x26   :  { %s2392_s4 = sld [smem:[%s2734_s0 + %s2242_s28]]   ;;  %s2246_s28 = smov 29  }
  0x27   :  { %s2397_s17 = sld [smem:[%s2734_s0 + %s2243_s7]]   ;;  %s2247_s7 = smov 30  }
  0x28   :  { %2756 = sst [smem:[#allocation15_spill]] %s2387_s27 }
  0x29   :  { %s2402_s6 = sld [smem:[%s2734_s0 + %s2244_s15]]   ;;  %s2248_s15 = smov 31  }
  0x2a   :  { %s2407_s27 = sld [smem:[%s2734_s0 + %s2245_s22]]   ;;  %s2249_s22 = smov 32  }
  0x2c   :  { %2757 = sst [smem:[#allocation16_spill]] %s2392_s4 }
  0x2d   :  { %2758 = sst [smem:[#allocation17_spill]] %s2397_s17 }
  0x2e   :  { %s2412_s4 = sld [smem:[%s2734_s0 + %s2246_s28]]   ;;  %s2250_s28 = smov 33  }
  0x2f   :  { %2759 = sst [smem:[#allocation18_spill]] %s2402_s6 }
  0x30   :  { %2760 = sst [smem:[#allocation19_spill]] %s2407_s27 }
  0x31   :  { %s2417_s17 = sld [smem:[%s2734_s0 + %s2247_s7]]   ;;  %s2251_s7 = smov 34  }
  0x32   :  { %s2422_s6 = sld [smem:[%s2734_s0 + %s2248_s15]]   ;;  %s2252_s15 = smov 35  }
  0x33   :  { %s2427_s27 = sld [smem:[%s2734_s0 + %s2249_s22]]   ;;  %s2253_s22 = smov 36  }
  0x34   :  { %2761 = sst [smem:[#allocation20_spill]] %s2412_s4 }
  0x35   :  { %s2432_s4 = sld [smem:[%s2734_s0 + %s2250_s28]]   ;;  %s2254_s28 = smov 37  }
  0x37   :  { %2762 = sst [smem:[#allocation21_spill]] %s2417_s17 }
  0x38   :  { %2763 = sst [smem:[#allocation22_spill]] %s2422_s6 }
  0x39   :  { %2764 = sst [smem:[#allocation23_spill]] %s2427_s27 }
  0x3a   :  { %s2437_s17 = sld [smem:[%s2734_s0 + %s2251_s7]]  }
  0x3b   :  { %2765 = sst [smem:[#allocation24_spill]] %s2432_s4 }
  0x3c   :  { %s2442_s6 = sld [smem:[%s2734_s0 + %s2252_s15]]  }
  0x3d   :  { %s2447_s27 = sld [smem:[%s2734_s0 + %s2253_s22]]  }
  0x3e   :  { %s2452_s4 = sld [smem:[%s2734_s0 + %s2254_s28]]  }
  0x3f   :  { %v2024_v0 = vld [vmem:[%s2287_s21 + $0x18] sm:$0xff]  ;;  %v2023_v1 = vld [vmem:[%s2287_s21 + $0x10] sm:$0xff]  ;;  %v2022_v2 = vld [vmem:[%s2287_s21 + $0x8] sm:$0xff] }
  0x40   :  { %298 = vmatpush.bf16.msra.mxu0 %v2024_v0 }
  0x44   :  { %299 = vmatpush.bf16.msra.mxu0 %v2023_v1 }
  0x45   :  { %81 = vsyncpa [#allocation3], 0  ;;  %v2021_v3 = vld [vmem:[%s2287_s21] sm:$0xff]  ;;  %vm287_vm0 = vcmask 523264   ;;  %v2058_v5 = vld [vmem:[%s2267_s5 + $0x8] sm:$0xff]  ;;  %vm342_vm1 = vcmask 261120  }
  0x46   :  { %v2057_v4 = vld [vmem:[%s2267_s5] sm:$0xff]  ;;  %v2028_v6 = vld [vmem:[%s2307_s8 + $0x8] sm:$0xff]  ;;  %vm438_vm2 = vcmask 64512   ;;  %s2255_s0 = smov 96   ;;  %vm470_vm3 = vcmask 1043456   ;;  %s2766_s5 = sld [smem:[#allocation6_spill]] }
  0x47   :  { %401 = vmatpush.bf16.msra.mxu2 %v2028_v6  ;;  %v2027_v7 = vld [vmem:[%s2307_s8] sm:$0xff]  ;;  %v2026_v9 = vld [vmem:[%s2297_s29 + $0x8] sm:$0xff]  ;;  %vm719_vm4 = vcmask 130048   ;;  %s2768_s21 = sld [smem:[#allocation9_spill]]  ;;  %vm1550_vm6 = vcmask 1040384   ;;  %vm1713_vm7 = vcmask 1041408  }
  0x48   :  { %300 = vmatpush.bf16.msra.mxu0 %v2022_v2  ;;  %v2059_v8 = vld [vmem:[%s2272_s9] sm:$0xff]  ;;  %355 = vmatpush.bf16.msra.mxu1 %v2026_v9  ;;  %s2767_s9 = sld [smem:[#allocation7_spill]]  ;;  %vm1715_vm8 = vcmask 1042432   ;;  %s1759_s26 = sshll.u32 %s2447_s27, 4  ;;  %s1760_s26 = int_to_ptr.hbm [resolvable:$true] %s1759_s26 }
  0x49   :  { %v2025_v10 = vld [vmem:[%s2297_s29] sm:$0xff]  ;;  %s2770_s29 = sld [smem:[#allocation8_spill]]  ;;  %s2204_s28 = sshra.s32 %s1760_s26, 4  ;;  %s2205_s28 = int_to_ptr.hbm [resolvable:$true] %s2204_s28 }
  0x4a   :  { %v2103_v12 = vld [vmem:[%s2292_s25] ss:$0 sm:$0xff]  ;;  %s2769_s25 = sld [smem:[#allocation11_spill]]  ;;  %s2206_s1 = scalar_lea.hbm %s2205_s28, 2 }
  0x4b   :  { %402 = vmatpush.bf16.msra.mxu2 %v2027_v7  ;;  %v2104_v30 = vld [vmem:[%s2312_s14] ss:$0 sm:$0xff]  ;;  %s2772_s8 = sld [smem:[#allocation15_spill]]  ;;  %p2207_p0 = scmp.ne.s32.totalorder %s2205_s28, %s2206_s1 }
  0x4c   :  { %301 = vmatpush.bf16.msra.mxu0 %v2021_v3  ;;  %356 = vmatpush.bf16.msra.mxu1 %v2025_v10  ;;  %v2105_v40 = vld [vmem:[%s2302_s3] ss:$0 sm:$0xff]  ;;  %s2771_s3 = sld [smem:[#allocation12_spill]]  ;;  %s2208_s2 = scalar_lea.hbm %s2447_s27, 2 }
  0x4d   :  { %s2773_s14 = sld [smem:[#allocation13_spill]]  ;;  %p2209_p1 = scmp.lt.s32.totalorder %s2205_s28, %s2447_s27 }
  0x4e   :  { %1859 = vmatmul.msk.bf16.vlgmr.msra.gmra.mxu2 %vm342_vm1, %v2059_v8  ;;  %s2779_s7 = sld [smem:[#allocation19_spill]]  ;;  %p2210_p2 = scmp.lt.s32.totalorder %s2208_s2, %s2206_s1 }
  0x4f   :  { %1835 = vmatmul.msk.bf16.vlgmr.msra.gmra.mxu0 %vm287_vm0, %v2057_v4  ;;  %s2780_s10 = sld [smem:[#allocation21_spill]] }
  0x50   :  { %s2781_s11 = sld [smem:[#allocation18_spill]]  ;;  %p2211_p3 = por %p2210_p2, %p2209_p1 }
  0x51   :  { %s2782_s15 = sld [smem:[#allocation20_spill]] }
  0x52   :  { %s2783_s16 = sld [smem:[#allocation22_spill]]  ;;  %p2212_p4 = pnand %p2211_p3, %p2207_p0 }
  0x53   :  { %s2784_s18 = sld [smem:[#allocation23_spill]] }
  0x54   :  { %s2785_s22 = sld [smem:[#allocation24_spill]] }
  0x5f   :  { %1836 = vmatmul.msk.bf16.gmra.mxu0 %vm287_vm0, %v2058_v5 }
  0xcc   :  { %v303_v11 = vpop.f32.mrf.mxu0 }
  0xcd   :  { %v2469_v13 = vadd.f32 %v2103_v12, %v303_v11 }
  0xcf   :  { %v313_v15 = vpack.c.bf16 %v2469_v13, %v2469_v13 }
  0xd1   :  { %v324_v18 = vunpack.c.l.b16 %v313_v15  ;;  %v404_v31 = vpop.f32.mrf.mxu2 }
  0xd2   :  { %v405_v32 = vadd.f32 %v2104_v30, %v404_v31 }
  0xd4   :  { %v305_v14 = vpop.f32.mrf.mxu0  ;;  %v409_v33 = vpack.c.bf16 %v405_v32, %v405_v32 }
  0xd5   :  { %v2473_v16 = vadd.f32 %v2103_v12, %v305_v14 }
  0xd6   :  { %v420_v37 = vsel %vm342_vm1, %v409_v33, 0  ;;  %v463_v5 = vunpack.c.l.b16 %v409_v33 }
  0xd7   :  { %v314_v17 = vpack.c.bf16 %v2473_v16, %v2473_v16  ;;  %429 = vmatpush.bf16.xpose.msra.mxu3 %v420_v37 }
  0xd8   :  { %v464_v7 = vpack.c.b16 %v463_v5, %v463_v5 }
  0xd9   :  { %v325_v19 = vunpack.c.l.b16 %v314_v17  ;;  %v406_v34 = vpop.f32.mrf.mxu2 }
  0xda   :  { %v407_v35 = vadd.f32 %v2104_v30, %v406_v34 }
  0xdb   :  { %v2477_v20 = vpack.c.b16 %v325_v19, %v324_v18 }
  0xdc   :  { %v308_v21 = vpop.f32.mrf.mxu0  ;;  %v2494_v36 = vpack.c.bf16 %v407_v35, %v407_v35 }
  0xdd   :  { %1845 = vmatmul.msk.bf16.vlgmr.msra.gmra.mxu1 %vm342_vm1, %v2477_v20  ;;  %v2481_v22 = vadd.f32 %v2103_v12, %v308_v21 }
  0xde   :  { %v497_v38 = vsel %vm342_vm1, %v2494_v36, 0  ;;  %v539_v37 = vunpack.c.l.b16 %v2494_v36 }
  0xdf   :  { %v315_v24 = vpack.c.bf16 %v2481_v22, %v2481_v22  ;;  %506 = vmatpush.bf16.xpose.msrb.mxu3 %v497_v38 }
  0xe0   :  { %v540_v38 = vpack.c.b16 %v539_v37, %v539_v37 }
  0xe1   :  { %v326_v27 = vunpack.c.l.b16 %v315_v24 }
  0xe4   :  { %v310_v23 = vpop.f32.mrf.mxu0 }
  0xe5   :  { %v2485_v25 = vadd.f32 %v2103_v12, %v310_v23 }
  0xe7   :  { %v316_v26 = vpack.c.bf16 %v2485_v25, %v2485_v25 }
  0xe9   :  { %v327_v28 = vunpack.c.l.b16 %v316_v26 }
  0xeb   :  { %v2489_v29 = vpack.c.b16 %v327_v28, %v326_v27 }
  0xed   :  { %1846 = vmatmul.msk.bf16.gmra.mxu1 %vm342_vm1, %v2489_v29 }
 0x15a   :  { %v358_v39 = vpop.f32.mrf.mxu1 }
 0x15b   :  { %v359_v41 = vadd.f32 %v2105_v40, %v358_v39 }
 0x15d   :  { %v368_v43 = vpack.c.bf16 %v359_v41, %v359_v41 }
 0x15f   :  { %v413_v46 = vunpack.c.l.b16 %v368_v43 }
 0x162   :  { %v360_v42 = vpop.f32.mrf.mxu1 }
 0x163   :  { %v361_v44 = vadd.f32 %v2105_v40, %v360_v42 }
 0x165   :  { %v369_v45 = vpack.c.bf16 %v361_v44, %v361_v44 }
 0x167   :  { %v414_v47 = vunpack.c.l.b16 %v369_v45 }
 0x169   :  { %v415_v48 = vpack.c.b16 %v414_v47, %v413_v46 }
 0x16a   :  { %v363_v49 = vpop.f32.mrf.mxu1 }
 0x16b   :  { %1860 = vmatmul.msk.bf16.vlgmr.msra.gmra.mxu3 %vm342_vm1, %v415_v48  ;;  %v364_v50 = vadd.f32 %v2105_v40, %v363_v49 }
 0x16d   :  { %v370_v52 = vpack.c.bf16 %v364_v50, %v364_v50 }
 0x16f   :  { %v490_v55 = vunpack.c.l.b16 %v370_v52 }
 0x172   :  { %v365_v51 = vpop.f32.mrf.mxu1 }
 0x173   :  { %v366_v53 = vadd.f32 %v2105_v40, %v365_v51 }
 0x175   :  { %v371_v54 = vpack.c.bf16 %v366_v53, %v366_v53 }
 0x177   :  { %v491_v56 = vunpack.c.l.b16 %v371_v54  ;;  %v2030_v54 = vld [vmem:[%s2317_s19 + $0x8] sm:$0xff] }
 0x179   :  { %v492_v57 = vpack.c.b16 %v491_v56, %v490_v55  ;;  %v2029_v55 = vld [vmem:[%s2317_s19] sm:$0xff]  ;;  %s2774_s19 = sld [smem:[#allocation5_spill]] }
 0x17b   :  { %1862 = vmatmul.msk.bf16.vlgmr.msrb.gmra.mxu3 %vm342_vm1, %v492_v57 }
 0x1ee   :  { %v431_v58 = vpop.f32.mrf.mxu3 }
 0x1ef   :  { %v436_v59 = vmul.f32 0.17677669, %v431_v58 }
 0x1f1   :  { %v439_v60 = vsel %vm438_vm2, %v436_v59, -inf }
 0x1f2   :  { %440 = vmax.xlane.f32.xlu0 %v439_v60 }
 0x1f6   :  { %v433_v61 = vpop.f32.mrf.mxu3 }
 0x1f7   :  { %v437_v62 = vmul.f32 0.17677669, %v433_v61 }
 0x1f9   :  { %v442_v63 = vsel %vm438_vm2, %v437_v62, -inf }
 0x1fa   :  { %443 = vmax.xlane.f32.xlu0 %v442_v63  ;;  %v2033_v63 = vld [vmem:[%s2337_s12] sm:$0xff] }
 0x1fe   :  { %v508_v0 = vpop.f32.mrf.mxu3 }
 0x1ff   :  { %v513_v1 = vmul.f32 0.17677669, %v508_v0  ;;  %v2032_v0 = vld [vmem:[%s2327_s30 + $0x8] sm:$0xff] }
 0x200   :  { %640 = vmatpush.bf16.msra.mxu3 %v2032_v0 }
 0x201   :  { %v515_v2 = vsel %vm438_vm2, %v513_v1, -inf }
 0x202   :  { %516 = vmax.xlane.f32.xlu1 %v515_v2  ;;  %v2060_v2 = vld [vmem:[%s2277_s13] sm:$0xff] }
 0x206   :  { %v510_v3 = vpop.f32.mrf.mxu3 }
 0x207   :  { %v514_v4 = vmul.f32 0.17677669, %v510_v3 }
 0x209   :  { %v518_v6 = vsel %vm438_vm2, %v514_v4, -inf }
 0x20a   :  { %519 = vmax.xlane.f32.xlu1 %v518_v6 }
 0x20e   :  { %465 = vrot.lane.b32.xlu0 %v464_v7, %s2255_s0 }
 0x265   :  { %v441_v8 = vpop.xlane.xlu0 %440 }
 0x266   :  { %v445_v9 = vsub.f32 %v436_v59, %v441_v8 }
 0x268   :  { %v447_v10 = vmul.f32 1.442695, %v445_v9 }
 0x26a   :  { %2118 = vpow2.f32 %v447_v10 }
 0x26d   :  { %v444_v11 = vpop.xlane.xlu0 %443 }
 0x26e   :  { %v446_v12 = vsub.f32 %v437_v62, %v444_v11  ;;  %v2034_v62 = vld [vmem:[%s2337_s12 + $0x8] sm:$0xff]  ;;  %s2777_s12 = sld [smem:[#allocation10_spill]] }
 0x26f   :  { %677 = vmatpush.bf16.msrb.mxu0 %v2034_v62 }
 0x270   :  { %v2119_v14 = vpop.eup %2118  ;;  %v449_v15 = vmul.f32 1.442695, %v446_v12 }
 0x271   :  { %v451_v17 = vsel %vm438_vm2, %v2119_v14, 0.0 }
 0x272   :  { %2120 = vpow2.f32 %v449_v15  ;;  %452 = vadd.xlane.f32.xlu2 %v451_v17 }
 0x273   :  { %678 = vmatpush.bf16.msrb.mxu0 %v2033_v63 }
 0x275   :  { %v517_v18 = vpop.xlane.xlu1 %516 }
 0x276   :  { %v521_v19 = vsub.f32 %v513_v1, %v517_v18  ;;  %v2031_v1 = vld [vmem:[%s2327_s30] sm:$0xff]  ;;  %s2776_s30 = sld [smem:[#allocation14_spill]] }
 0x277   :  { %641 = vmatpush.bf16.msra.mxu3 %v2031_v1 }
 0x278   :  { %v2121_v21 = vpop.eup %2120  ;;  %v523_v23 = vmul.f32 1.442695, %v521_v19 }
 0x279   :  { %v454_v24 = vsel %vm438_vm2, %v2121_v21, 0.0 }
 0x27a   :  { %2122 = vpow2.f32 %v523_v23  ;;  %455 = vadd.xlane.f32.xlu2 %v454_v24  ;;  %1886 = vmatmul.msk.bf16.vlgmr.msra.gmra.mxu3 %vm342_vm1, %v2060_v2  ;;  %v2107_v23 = vld [vmem:[%s2342_s20] ss:$0 sm:$0xff]  ;;  %s2778_s20 = sld [smem:[#allocation17_spill]] }
 0x27d   :  { %v520_v26 = vpop.xlane.xlu1 %519 }
 0x27e   :  { %v522_v27 = vsub.f32 %v514_v4, %v520_v26  ;;  %v2106_v4 = vld [vmem:[%s2322_s24] ss:$0 sm:$0xff]  ;;  %s2775_s24 = sld [smem:[#allocation16_spill]] }
 0x280   :  { %v2123_v28 = vpop.eup %2122  ;;  %v525_v30 = vmul.f32 1.442695, %v522_v27  ;;  %v466_v31 = vpop.permute.xlu0 %465 }
 0x281   :  { %v527_v32 = vsel %vm438_vm2, %v2123_v28, 0.0  ;;  %v472_v33 = vsel %vm470_vm3, %v466_v31, 0  ;;  %v2108_v31 = vld [vmem:[%s2766_s5] ss:$0 sm:$0xff] }
 0x282   :  { %2124 = vpow2.f32 %v525_v30  ;;  %528 = vadd.xlane.f32.xlu1 %v527_v32  ;;  %481 = vmatpush.bf16.msrb.mxu2 %v472_v33 }
 0x286   :  { %592 = vmatpush.bf16.msra.mxu2 %v2030_v54 }
 0x288   :  { %v2125_v34 = vpop.eup %2124 }
 0x289   :  { %v530_v35 = vsel %vm438_vm2, %v2125_v34, 0.0 }
 0x28a   :  { %531 = vadd.xlane.f32.xlu2 %v530_v35  ;;  %593 = vmatpush.bf16.msra.mxu2 %v2029_v55 }
 0x29b   :  { %541 = vrot.lane.b32.xlu1 %v540_v38, %s2255_s0 }
 0x2e5   :  { %v453_v39 = vpop.xlane.xlu2 %452 }
 0x2e6   :  { %2126 = vrcp.f32 %v453_v39 }
 0x2ec   :  { %v2127_v41 = vpop.eup %2126 }
 0x2ed   :  { %v456_v40 = vpop.xlane.xlu2 %455  ;;  %v459_v43 = vmul.f32 %v2127_v41, %v2119_v14 }
 0x2ee   :  { %2128 = vrcp.f32 %v456_v40 }
 0x2f4   :  { %v2129_v42 = vpop.eup %2128 }
 0x2f5   :  { %v460_v44 = vmul.f32 %v2129_v42, %v2121_v21  ;;  %v529_v47 = vpop.xlane.xlu1 %528 }
 0x2f7   :  { %v461_v45 = vpack.c.bf16 %v460_v44, %v459_v43 }
 0x2f9   :  { %1861 = vmatmul.msk.bf16.vlgmr.msrb.gmra.mxu2 %vm438_vm2, %v461_v45 }
 0x2fd   :  { %v532_v46 = vpop.xlane.xlu2 %531  ;;  %v643_v33 = vpop.f32.mrf.mxu3 }
 0x2fe   :  { %2130 = vrcp.f32 %v532_v46 }
 0x2ff   :  { %2132 = vrcp.f32 %v529_v47 }
 0x304   :  { %v2131_v36 = vpop.eup %2130 }
 0x305   :  { %v2133_v48 = vpop.eup %2132  ;;  %v536_v49 = vmul.f32 %v2131_v36, %v2125_v34  ;;  %v645_v45 = vpop.f32.mrf.mxu3 }
 0x306   :  { %v535_v51 = vmul.f32 %v2133_v48, %v2123_v28  ;;  %v646_v47 = vadd.f32 %v2108_v31, %v645_v45 }
 0x308   :  { %v537_v53 = vpack.c.bf16 %v536_v49, %v535_v51  ;;  %v649_v36 = vpack.c.bf16 %v646_v47, %v646_v47 }
 0x30d   :  { %v542_v50 = vpop.permute.xlu1 %541 }
 0x30e   :  { %v547_v52 = vsel %vm470_vm3, %v542_v50, 0 }
 0x30f   :  { %556 = vmatpush.bf16.msrb.mxu1 %v547_v52 }
 0x312   :  { %1863 = vmatmul.msk.bf16.vlgmr.msrb.gmra.mxu1 %vm438_vm2, %v537_v53 }
 0x37c   :  { %v483_v56 = vpop.f32.mrf.mxu2 }
 0x384   :  { %v485_v57 = vpop.f32.mrf.mxu2 }
 0x385   :  { %v563_v58 = vpack.c.bf16 %v485_v57, %v483_v56 }
 0x387   :  { %1872 = vmatmul.msk.bf16.vlgmr.msra.gmra.mxu2 %vm342_vm1, %v563_v58 }
 0x38f   :  { %v558_v59 = vpop.f32.mrf.mxu1 }
 0x397   :  { %v560_v60 = vpop.f32.mrf.mxu1 }
 0x398   :  { %v564_v61 = vpack.c.bf16 %v560_v60, %v558_v59 }
 0x39a   :  { %1873 = vmatmul.msk.bf16.gmra.mxu2 %vm342_vm1, %v564_v61 }
 0x40a   :  { %v595_v3 = vpop.f32.mrf.mxu2 }
 0x40b   :  { %v596_v5 = vadd.f32 %v2106_v4, %v595_v3 }
 0x40d   :  { %v605_v8 = vadd.f32 %v596_v5, %v2469_v13 }
 0x412   :  { %v597_v6 = vpop.f32.mrf.mxu2 }
 0x413   :  { %v598_v7 = vadd.f32 %v2106_v4, %v597_v6 }
 0x415   :  { %v606_v9 = vadd.f32 %v598_v7, %v2473_v16  ;;  %v2036_v7 = vld [vmem:[%s2767_s9 + $0x8] sm:$0xff] }
 0x417   :  { %v609_v10 = vpack.c.bf16 %v606_v9, %v605_v8 }
 0x419   :  { %1895 = vmatmul.msk.bf16.vlgmr.msrb.gmra.mxu0 %vm342_vm1, %v609_v10 }
 0x41d   :  { %v600_v11 = vpop.f32.mrf.mxu2 }
 0x41e   :  { %v601_v12 = vadd.f32 %v2106_v4, %v600_v11 }
 0x420   :  { %v607_v17 = vadd.f32 %v601_v12, %v2481_v22  ;;  %v644_v22 = vadd.f32 %v2108_v31, %v643_v33 }
 0x422   :  { %v648_v35 = vpack.c.bf16 %v644_v22, %v644_v22 }
 0x425   :  { %v602_v14 = vpop.f32.mrf.mxu2 }
 0x426   :  { %v603_v15 = vadd.f32 %v2106_v4, %v602_v14  ;;  %v2035_v14 = vld [vmem:[%s2767_s9] sm:$0xff] }
 0x428   :  { %v608_v18 = vadd.f32 %v603_v15, %v2485_v25 }
 0x42a   :  { %v610_v19 = vpack.c.bf16 %v608_v18, %v607_v17 }
 0x42c   :  { %1896 = vmatmul.msk.bf16.gmra.mxu0 %vm342_vm1, %v610_v19 }
 0x496   :  { %v680_v21 = vpop.f32.mrf.mxu0 }
 0x497   :  { %v681_v13 = vadd.f32 %v2107_v23, %v680_v21 }
 0x499   :  { %v690_v16 = vpack.c.bf16 %v681_v13, %v681_v13  ;;  %v2040_v13 = vld [vmem:[%s2769_s25 + $0x8] sm:$0xff] }
 0x49b   :  { %v696_v28 = vunpack.c.l.b16 %v690_v16  ;;  %v2039_v16 = vld [vmem:[%s2769_s25] sm:$0xff] }
 0x49e   :  { %v682_v24 = vpop.f32.mrf.mxu0 }
 0x49f   :  { %v683_v26 = vadd.f32 %v2107_v23, %v682_v24  ;;  %v2037_v24 = vld [vmem:[%s2768_s21] sm:$0xff] }
 0x4a1   :  { %v691_v27 = vpack.c.bf16 %v683_v26, %v683_v26  ;;  %v2109_v26 = vld [vmem:[%s2770_s29] ss:$0 sm:$0xff] }
 0x4a3   :  { %v697_v30 = vunpack.c.l.b16 %v691_v27  ;;  %v246_v27 = vld [vmem:[%s2277_s13] sm:$0xff]   ;;  %s2256_s13 = smov 64  }
 0x4a4   :  { %v808_v33 = vunpack.c.h.bf16 %v246_v27 }
 0x4a5   :  { %v698_v32 = vpack.c.b16 %v697_v30, %v696_v28  ;;  %v807_v30 = vunpack.c.l.bf16 %v246_v27 }
 0x4a7   :  { %v703_v34 = vsel %vm342_vm1, %v698_v32, 0 }
 0x4a8   :  { %712 = vmatpush.bf16.xpose.msra.mxu1 %v703_v34 }
 0x4a9   :  { %v685_v25 = vpop.f32.mrf.mxu0 }
 0x4aa   :  { %v686_v37 = vadd.f32 %v2107_v23, %v685_v25 }
 0x4ac   :  { %v692_v39 = vpack.c.bf16 %v686_v37, %v686_v37 }
 0x4ae   :  { %v753_v42 = vunpack.c.l.b16 %v692_v39 }
 0x4af   :  { %1897 = vmatmul.msk.bf16.vlgmr.msra.gmra.mxu1 %vm342_vm1, %v648_v35 }
 0x4b1   :  { %v687_v38 = vpop.f32.mrf.mxu0 }
 0x4b2   :  { %v688_v40 = vadd.f32 %v2107_v23, %v687_v38  ;;  %v2038_v23 = vld [vmem:[%s2768_s21 + $0x8] sm:$0xff] }
 0x4b3   :  { %875 = vmatpush.bf16.msra.mxu0 %v2038_v23 }
 0x4b4   :  { %v693_v41 = vpack.c.bf16 %v688_v40, %v688_v40 }
 0x4b6   :  { %v754_v43 = vunpack.c.l.b16 %v693_v41  ;;  %v2111_v41 = vld [vmem:[%s2771_s3] ss:$0 sm:$0xff] }
 0x4b7   :  { %876 = vmatpush.bf16.msra.mxu0 %v2037_v24 }
 0x4b8   :  { %v755_v44 = vpack.c.b16 %v754_v43, %v753_v42 }
 0x4ba   :  { %788 = vrot.lane.b32.xlu1 %v755_v44, %s2255_s0  ;;  %v760_v46 = vsel %vm342_vm1, %v755_v44, 0 }
 0x4bb   :  { %769 = vmatpush.bf16.xpose.msrb.mxu1 %v760_v46 }
 0x4c2   :  { %1899 = vmatmul.msk.bf16.vlgmr.msrb.gmra.mxu1 %vm342_vm1, %v649_v36 }
 0x4c3   :  { %904 = vmatpush.bf16.msra.mxu1 %v2040_v13 }
 0x4c7   :  { %905 = vmatpush.bf16.msra.mxu1 %v2039_v16 }
 0x52c   :  { %v789_v48 = vpop.permute.xlu1 %788  ;;  %v714_v49 = vpop.f32.mrf.mxu1 }
 0x52d   :  { %v718_v50 = vmul.f32 0.17677669, %v714_v49  ;;  %801 = vmatpush.bf16.msrb.mxu2 %v789_v48 }
 0x52f   :  { %v720_v51 = vsel %vm719_vm4, %v718_v50, -inf }
 0x530   :  { %721 = vmax.xlane.f32.xlu2 %v720_v51 }
 0x534   :  { %v716_v52 = vpop.f32.mrf.mxu1 }
 0x53f   :  { %v771_v53 = vpop.f32.mrf.mxu1 }
 0x540   :  { %v775_v54 = vmul.f32 0.17677669, %v771_v53 }
 0x542   :  { %v776_v55 = vsel %vm719_vm4, %v775_v54, -inf }
 0x543   :  { %777 = vmax.xlane.f32.xlu2 %v776_v55 }
 0x547   :  { %v773_v56 = vpop.f32.mrf.mxu1 }
 0x5a3   :  { %v722_v57 = vpop.xlane.xlu2 %721 }
 0x5a4   :  { %v723_v58 = vsub.f32 %v718_v50, %v722_v57 }
 0x5a6   :  { %v724_v59 = vmul.f32 1.442695, %v723_v58 }
 0x5a8   :  { %2134 = vpow2.f32 %v724_v59 }
 0x5ae   :  { %v2135_v60 = vpop.eup %2134 }
 0x5af   :  { %v726_v61 = vsel %vm719_vm4, %v2135_v60, 0.0 }
 0x5b0   :  { %727 = vadd.xlane.f32.xlu0 %v726_v61 }
 0x5b6   :  { %v778_v62 = vpop.xlane.xlu2 %777 }
 0x5b7   :  { %v779_v63 = vsub.f32 %v775_v54, %v778_v62 }
 0x5b9   :  { %v780_v0 = vmul.f32 1.442695, %v779_v63 }
 0x5bb   :  { %2136 = vpow2.f32 %v780_v0 }
 0x5c1   :  { %v2137_v1 = vpop.eup %2136 }
 0x5c2   :  { %v782_v2 = vsel %vm719_vm4, %v2137_v1, 0.0 }
 0x5c3   :  { %783 = vadd.xlane.f32.xlu2 %v782_v2 }
 0x5db   :  { %732 = vrot.lane.b32.xlu2 %v698_v32, %s2255_s0 }
 0x623   :  { %v728_v3 = vpop.xlane.xlu0 %727 }
 0x624   :  { %2138 = vrcp.f32 %v728_v3 }
 0x62a   :  { %v2139_v5 = vpop.eup %2138 }
 0x62b   :  { %v730_v6 = vmul.f32 %v2139_v5, %v2135_v60 }
 0x62d   :  { %v731_v11 = vpack.c.bf16 %v730_v6, %v730_v6 }
 0x636   :  { %v784_v4 = vpop.xlane.xlu2 %783 }
 0x637   :  { %2140 = vrcp.f32 %v784_v4 }
 0x63d   :  { %v2141_v8 = vpop.eup %2140 }
 0x63e   :  { %v786_v9 = vmul.f32 %v2141_v8, %v2137_v1  ;;  %v733_v10 = vpop.permute.xlu2 %732 }
 0x63f   :  { %745 = vmatpush.bf16.msrb.mxu3 %v733_v10 }
 0x640   :  { %v787_v12 = vpack.c.bf16 %v786_v9, %v786_v9 }
 0x642   :  { %1898 = vmatmul.msk.bf16.vlgmr.msrb.gmra.mxu3 %vm719_vm4, %v731_v11  ;;  %1900 = vmatmul.msk.bf16.vlgmr.msrb.gmra.mxu2 %vm719_vm4, %v787_v12 }
 0x643   :  { %834 = vmatpush.bf16.msra.mxu3 %v2036_v7 }
 0x647   :  { %835 = vmatpush.bf16.msra.mxu3 %v2035_v14 }
 0x6c5   :  { %v747_v15 = vpop.f32.mrf.mxu3  ;;  %v803_v17 = vpop.f32.mrf.mxu2 }
 0x6c6   :  { %v809_v18 = vpack.c.bf16 %v803_v17, %v747_v15 }
 0x6c8   :  { %1909 = vmatmul.msk.bf16.vlgmr.msra.gmra.mxu3 %vm342_vm1, %v809_v18 }
 0x6cd   :  { %v749_v19 = vpop.f32.mrf.mxu3  ;;  %v805_v21 = vpop.f32.mrf.mxu2 }
 0x74b   :  { %v837_v28 = vpop.f32.mrf.mxu3 }
 0x74c   :  { %v838_v31 = vadd.f32 %v2109_v26, %v837_v28 }
 0x74e   :  { %v842_v32 = vadd.f32 %v838_v31, %v807_v30 }
 0x750   :  { %v844_v25 = vpack.c.bf16 %v842_v32, %v842_v32 }
 0x752   :  { %v851_v38 = vunpack.c.l.b16 %v844_v25 }
 0x753   :  { %v839_v34 = vpop.f32.mrf.mxu3 }
 0x754   :  { %v840_v22 = vadd.f32 %v2109_v26, %v839_v34 }
 0x756   :  { %v843_v35 = vadd.f32 %v840_v22, %v808_v33 }
 0x758   :  { %v845_v37 = vpack.c.bf16 %v843_v35, %v843_v35 }
 0x75a   :  { %v852_v39 = vunpack.c.l.b16 %v845_v37 }
 0x75c   :  { %v2557_v40 = vpack.c.b16 %v852_v39, %v851_v38 }
 0x75e   :  { %1918 = vmatmul.msk.bf16.vlgmr.msra.gmra.mxu0 %vm342_vm1, %v2557_v40  ;;  %1927 = vmatmul.msk.bf16.vlgmr.msra.gmra.mxu1 %vm342_vm1, %v2557_v40 }
 0x76e   :  { %1928 = vmatmul.msk.bf16.gmra.mxu1 %vm342_vm1, %v2477_v20 }
 0x77e   :  { %1929 = vmatmul.msk.bf16.gmra.mxu1 %vm342_vm1, %v2489_v29 }
 0x7db   :  { %v907_v42 = vpop.f32.mrf.mxu1  ;;  %v2580_v3 = vpop.f32.mrf.mxu0 }
 0x7dc   :  { %v908_v43 = vadd.f32 %v2111_v41, %v907_v42 }
 0x7de   :  { %v922_v63 = vpack.c.bf16 %v908_v43, %v908_v43 }
 0x7e0   :  { %v1045_v15 = vunpack.c.l.b16 %v922_v63 }
 0x7e2   :  { %v2592_v18 = vpack.c.b16 %v1045_v15, %v1045_v15 }
 0x7e3   :  { %v909_v44 = vpop.f32.mrf.mxu1  ;;  %v2582_v6 = vpop.f32.mrf.mxu0 }
 0x7e4   :  { %v910_v45 = vadd.f32 %v2111_v41, %v909_v44 }
 0x7e6   :  { %v923_v2 = vpack.c.bf16 %v910_v45, %v910_v45 }
 0x7e8   :  { %v1117_v14 = vunpack.c.l.b16 %v923_v2 }
 0x7ea   :  { %v2588_v17 = vpack.c.b16 %v1117_v14, %v1117_v14 }
 0x7eb   :  { %v912_v46 = vpop.f32.mrf.mxu1 }
 0x7ec   :  { %v913_v47 = vadd.f32 %v2111_v41, %v912_v46 }
 0x7ee   :  { %v924_v48 = vpack.c.bf16 %v913_v47, %v913_v47 }
 0x7f0   :  { %v930_v51 = vunpack.c.l.b16 %v924_v48 }
 0x7f3   :  { %v914_v36 = vpop.f32.mrf.mxu1 }
 0x7f4   :  { %v915_v49 = vadd.f32 %v2111_v41, %v914_v36 }
 0x7f6   :  { %v925_v50 = vpack.c.bf16 %v915_v49, %v915_v49 }
 0x7f8   :  { %v931_v52 = vunpack.c.l.b16 %v925_v50 }
 0x7fa   :  { %v2568_v53 = vpack.c.b16 %v931_v52, %v930_v51 }
 0x7fb   :  { %v917_v54 = vpop.f32.mrf.mxu1 }
 0x7fc   :  { %933 = vrot.lane.b32.xlu1 %v2568_v53, %s2255_s0  ;;  %v918_v20 = vadd.f32 %v2111_v41, %v917_v54 }
 0x7fe   :  { %v926_v55 = vpack.c.bf16 %v918_v20, %v918_v20 }
 0x800   :  { %v988_v58 = vunpack.c.l.b16 %v926_v55 }
 0x803   :  { %v919_v29 = vpop.f32.mrf.mxu1 }
 0x804   :  { %v920_v56 = vadd.f32 %v2111_v41, %v919_v29 }
 0x806   :  { %v927_v57 = vpack.c.bf16 %v920_v56, %v920_v56 }
 0x808   :  { %v989_v59 = vunpack.c.l.b16 %v927_v57 }
 0x80a   :  { %v2572_v60 = vpack.c.b16 %v989_v59, %v988_v58 }
 0x80c   :  { %991 = vrot.lane.b32.xlu1 %v2572_v60, %s2255_s0 }
 0x86e   :  { %v934_v61 = vpop.permute.xlu1 %933 }
 0x86f   :  { %v939_v62 = vsel %vm342_vm1, %v934_v61, 0 }
 0x870   :  { %948 = vmatpush.bf16.xpose.msra.mxu2 %v939_v62 }
 0x877   :  { %1930 = vmatmul.msk.bf16.vlgmr.msra.gmra.mxu2 %vm342_vm1, %v922_v63 }
 0x87e   :  { %v992_v0 = vpop.permute.xlu1 %991 }
 0x87f   :  { %v997_v1 = vsel %vm342_vm1, %v992_v0, 0 }
 0x880   :  { %1006 = vmatpush.bf16.xpose.msrb.mxu0 %v997_v1 }
 0x887   :  { %1932 = vmatmul.msk.bf16.vlgmr.msrb.gmra.mxu0 %vm342_vm1, %v923_v2 }
 0x8fa   :  { %v950_v4 = vpop.f32.mrf.mxu2 }
 0x8fb   :  { %v954_v5 = vmul.f32 0.17677669, %v950_v4 }
 0x8fd   :  { %v955_v7 = vsel %vm719_vm4, %v954_v5, -inf }
 0x8fe   :  { %956 = vmax.xlane.f32.xlu2 %v955_v7 }
 0x902   :  { %v952_v8 = vpop.f32.mrf.mxu2 }
 0x904   :  { %v1008_v9 = vpop.f32.mrf.mxu0 }
 0x905   :  { %v1012_v10 = vmul.f32 0.17677669, %v1008_v9 }
 0x907   :  { %v1013_v11 = vsel %vm719_vm4, %v1012_v10, -inf }
 0x908   :  { %1014 = vmax.xlane.f32.xlu1 %v1013_v11 }
 0x90c   :  { %v1010_v12 = vpop.f32.mrf.mxu0 }
 0x916   :  { %1025 = vrot.lane.b32.xlu2 %v2572_v60, %s2256_s13 }
 0x91e   :  { %1119 = vrot.lane.b32.xlu2 %v2588_v17, %s2255_s0 }
 0x921   :  { %1047 = vrot.lane.b32.xlu1 %v2592_v18, %s2255_s0 }
 0x971   :  { %v957_v19 = vpop.xlane.xlu2 %956 }
 0x972   :  { %v958_v21 = vsub.f32 %v954_v5, %v957_v19 }
 0x974   :  { %v959_v23 = vmul.f32 1.442695, %v958_v21 }
 0x976   :  { %2142 = vpow2.f32 %v959_v23 }
 0x979   :  { %v1026_v13 = vpop.permute.xlu2 %1025 }
 0x97a   :  { %1038 = vmatpush.bf16.msrb.mxu2 %v1026_v13 }
 0x97b   :  { %v1015_v28 = vpop.xlane.xlu1 %1014 }
 0x97c   :  { %v2143_v24 = vpop.eup %2142  ;;  %v1016_v30 = vsub.f32 %v1012_v10, %v1015_v28 }
 0x97d   :  { %v961_v16 = vsel %vm719_vm4, %v2143_v24, 0.0 }
 0x97e   :  { %962 = vadd.xlane.f32.xlu0 %v961_v16  ;;  %v1017_v31 = vmul.f32 1.442695, %v1016_v30 }
 0x980   :  { %2144 = vpow2.f32 %v1017_v31 }
 0x981   :  { %v1120_v26 = vpop.permute.xlu2 %1119 }
 0x982   :  { %v1125_v27 = vsel %vm342_vm1, %v1120_v26, 0 }
 0x983   :  { %1134 = vmatpush.bf16.xpose.msra.mxu2 %v1125_v27 }
 0x986   :  { %v2145_v32 = vpop.eup %2144 }
 0x987   :  { %v1019_v33 = vsel %vm719_vm4, %v2145_v32, 0.0 }
 0x992   :  { %967 = vrot.lane.b32.xlu0 %v2568_v53, %s2256_s13 }
 0x993   :  { %v1048_v25 = vpop.permute.xlu1 %1047 }
 0x994   :  { %v1053_v38 = vsel %vm342_vm1, %v1048_v25, 0 }
 0x9bc   :  { %1020 = vadd.xlane.f32.xlu0 %v1019_v33 }
 0x9f1   :  { %v963_v34 = vpop.xlane.xlu0 %962 }
 0x9f2   :  { %2146 = vrcp.f32 %v963_v34 }
 0x9f8   :  { %v2147_v22 = vpop.eup %2146 }
 0x9f9   :  { %v965_v35 = vmul.f32 %v2147_v22, %v2143_v24 }
 0x9fb   :  { %v966_v39 = vpack.c.bf16 %v965_v35, %v965_v35 }
 0xa04   :  { %v968_v37 = vpop.permute.xlu0 %967 }
 0xa05   :  { %980 = vmatpush.bf16.msrb.mxu3 %v968_v37 }
 0xa08   :  { %1931 = vmatmul.msk.bf16.vlgmr.msrb.gmra.mxu3 %vm719_vm4, %v966_v39 }
 0xa09   :  { %1062 = vmatpush.bf16.xpose.msra.mxu3 %v1053_v38 }
 0xa18   :  { %1934 = vmatmul.msk.bf16.vlgmr.msra.gmra.mxu3 %vm342_vm1, %v2568_v53 }
 0xa2f   :  { %v1021_v41 = vpop.xlane.xlu0 %1020 }
 0xa30   :  { %2148 = vrcp.f32 %v1021_v41 }
 0xa36   :  { %v2149_v42 = vpop.eup %2148 }
 0xa37   :  { %v1023_v43 = vmul.f32 %v2149_v42, %v2145_v32 }
 0xa39   :  { %v1024_v44 = vpack.c.bf16 %v1023_v43, %v1023_v43  ;;  %v2044_v43 = vld [vmem:[%s2772_s8 + $0x8] sm:$0xff] }
 0xa3b   :  { %1933 = vmatmul.msk.bf16.vlgmr.msrb.gmra.mxu2 %vm719_vm4, %v1024_v44  ;;  %v2043_v44 = vld [vmem:[%s2772_s8] sm:$0xff] }
 0xa4b   :  { %1936 = vmatmul.msk.bf16.vlgmr.msra.gmra.mxu2 %vm342_vm1, %v2572_v60 }
 0xa8b   :  { %v982_v45 = vpop.f32.mrf.mxu3 }
 0xa8c   :  { %v1192_v52 = vpack.c.bf16 %v982_v45, %v982_v45 }
 0xa8e   :  { %v2610_v20 = vunpack.c.l.b16 %v1192_v52 }
 0xa93   :  { %v984_v46 = vpop.f32.mrf.mxu3 }
 0xa9b   :  { %v1064_v47 = vpop.f32.mrf.mxu3 }
 0xa9c   :  { %v1069_v36 = vmul.f32 0.17677669, %v1064_v47 }
 0xa9e   :  { %v1071_v48 = vsel %vm438_vm2, %v1069_v36, -inf }
 0xa9f   :  { %1072 = vmax.xlane.f32.xlu1 %v1071_v48 }
 0xaa3   :  { %v1066_v49 = vpop.f32.mrf.mxu3 }
 0xaa4   :  { %v1070_v50 = vmul.f32 0.17677669, %v1066_v49 }
 0xaa6   :  { %v1074_v51 = vsel %vm438_vm2, %v1070_v50, -inf }
 0xaa7   :  { %1075 = vmax.xlane.f32.xlu2 %v1074_v51 }
 0xabe   :  { %v1040_v53 = vpop.f32.mrf.mxu2 }
 0xabf   :  { %v1193_v54 = vpack.c.bf16 %v1040_v53, %v1040_v53 }
 0xac1   :  { %v2612_v29 = vunpack.c.l.b16 %v1193_v54 }
 0xac3   :  { %v1208_v55 = vpack.c.b16 %v2612_v29, %v2610_v20 }
 0xac6   :  { %v1042_v56 = vpop.f32.mrf.mxu2 }
 0xace   :  { %v1136_v57 = vpop.f32.mrf.mxu2 }
 0xacf   :  { %v1141_v58 = vmul.f32 0.17677669, %v1136_v57 }
 0xad1   :  { %v1143_v59 = vsel %vm438_vm2, %v1141_v58, -inf }
 0xad2   :  { %1144 = vmax.xlane.f32.xlu0 %v1143_v59  ;;  %v2042_v59 = vld [vmem:[%s2773_s14 + $0x8] sm:$0xff] }
 0xad3   :  { %1299 = vmatpush.bf16.msrb.mxu1 %v2042_v59 }
 0xad6   :  { %v1138_v60 = vpop.f32.mrf.mxu2 }
 0xad7   :  { %v1142_v61 = vmul.f32 0.17677669, %v1138_v60  ;;  %v2041_v60 = vld [vmem:[%s2773_s14] sm:$0xff] }
 0xad8   :  { %1300 = vmatpush.bf16.msrb.mxu1 %v2041_v60 }
 0xad9   :  { %v1146_v62 = vsel %vm438_vm2, %v1142_v61, -inf }
 0xada   :  { %1147 = vmax.xlane.f32.xlu0 %v1146_v62 }
 0xb12   :  { %v1073_v63 = vpop.xlane.xlu1 %1072 }
 0xb13   :  { %v1077_v0 = vsub.f32 %v1069_v36, %v1073_v63 }
 0xb15   :  { %v1079_v1 = vmul.f32 1.442695, %v1077_v0 }
 0xb17   :  { %2150 = vpow2.f32 %v1079_v1 }
 0xb1a   :  { %v1076_v2 = vpop.xlane.xlu2 %1075 }
 0xb1b   :  { %v1078_v4 = vsub.f32 %v1070_v50, %v1076_v2 }
 0xb1d   :  { %v2151_v5 = vpop.eup %2150  ;;  %v1081_v7 = vmul.f32 1.442695, %v1078_v4 }
 0xb1e   :  { %v1083_v8 = vsel %vm438_vm2, %v2151_v5, 0.0 }
 0xb1f   :  { %2152 = vpow2.f32 %v1081_v7  ;;  %1084 = vadd.xlane.f32.xlu0 %v1083_v8 }
 0xb25   :  { %v2153_v9 = vpop.eup %2152 }
 0xb26   :  { %v1086_v10 = vsel %vm438_vm2, %v2153_v9, 0.0 }
 0xb27   :  { %1087 = vadd.xlane.f32.xlu0 %v1086_v10 }
 0xb3b   :  { %1094 = vrot.lane.b32.xlu0 %v2592_v18, %s2256_s13 }
 0xb45   :  { %v1145_v11 = vpop.xlane.xlu0 %1144 }
 0xb46   :  { %v1149_v12 = vsub.f32 %v1141_v58, %v1145_v11 }
 0xb48   :  { %v1151_v14 = vmul.f32 1.442695, %v1149_v12 }
 0xb4a   :  { %2154 = vpow2.f32 %v1151_v14 }
 0xb4d   :  { %v1148_v15 = vpop.xlane.xlu0 %1147 }
 0xb4e   :  { %v1150_v19 = vsub.f32 %v1142_v61, %v1148_v15  ;;  %v2061_v61 = vld [vmem:[%s2774_s19] sm:$0xff] }
 0xb4f   :  { %1962 = vmatmul.msk.bf16.vlgmr.msrb.gmra.mxu1 %vm342_vm1, %v2061_v61 }
 0xb50   :  { %v2155_v21 = vpop.eup %2154  ;;  %v1153_v23 = vmul.f32 1.442695, %v1150_v19 }
 0xb51   :  { %v1155_v13 = vsel %vm438_vm2, %v2155_v21, 0.0 }
 0xb52   :  { %2156 = vpow2.f32 %v1153_v23  ;;  %1156 = vadd.xlane.f32.xlu1 %v1155_v13 }
 0xb58   :  { %v2157_v24 = vpop.eup %2156 }
 0xb59   :  { %v1158_v16 = vsel %vm438_vm2, %v2157_v24, 0.0 }
 0xb5a   :  { %1159 = vadd.xlane.f32.xlu2 %v1158_v16 }
 0xb6b   :  { %1166 = vrot.lane.b32.xlu1 %v2588_v17, %s2256_s13 }
 0xb92   :  { %v1085_v18 = vpop.xlane.xlu0 %1084 }
 0xb9a   :  { %v1088_v26 = vpop.xlane.xlu0 %1087 }
 0xb9b   :  { %2158 = vrcp.f32 %v1088_v26 }
 0xb9c   :  { %2160 = vrcp.f32 %v1085_v18 }
 0xba1   :  { %v2159_v27 = vpop.eup %2158 }
 0xba2   :  { %v2161_v28 = vpop.eup %2160  ;;  %v1092_v30 = vmul.f32 %v2159_v27, %v2153_v9 }
 0xba3   :  { %v1091_v32 = vmul.f32 %v2161_v28, %v2151_v5  ;;  %v2112_v5 = vld [vmem:[%s2775_s24] ss:$0 sm:$0xff] }
 0xba5   :  { %v1093_v34 = vpack.c.bf16 %v1092_v30, %v1091_v32  ;;  %v2113_v32 = vld [vmem:[%s2776_s30] ss:$0 sm:$0xff] }
 0xbad   :  { %v1095_v31 = vpop.permute.xlu0 %1094 }
 0xbae   :  { %v1100_v33 = vsel %vm470_vm3, %v1095_v31, 0 }
 0xbaf   :  { %1109 = vmatpush.bf16.msra.mxu0 %v1100_v33 }
 0xbb2   :  { %1935 = vmatmul.msk.bf16.vlgmr.msra.gmra.mxu0 %vm438_vm2, %v1093_v34 }
 0xbb3   :  { %1239 = vmatpush.bf16.msrb.mxu0 %v2044_v43 }
 0xbb7   :  { %1240 = vmatpush.bf16.msrb.mxu0 %v2043_v44 }
 0xbc5   :  { %v1157_v25 = vpop.xlane.xlu1 %1156 }
 0xbcd   :  { %v1160_v22 = vpop.xlane.xlu2 %1159 }
 0xbce   :  { %2162 = vrcp.f32 %v1160_v22  ;;  %v1302_v22 = vpop.f32.mrf.mxu1 }
 0xbcf   :  { %2164 = vrcp.f32 %v1157_v25 }
 0xbd4   :  { %v2163_v17 = vpop.eup %2162 }
 0xbd5   :  { %v2165_v35 = vpop.eup %2164  ;;  %v1164_v37 = vmul.f32 %v2163_v17, %v2157_v24 }
 0xbd6   :  { %v1163_v39 = vmul.f32 %v2165_v35, %v2155_v21  ;;  %v1304_v44 = vpop.f32.mrf.mxu1 }
 0xbd8   :  { %v1165_v42 = vpack.c.bf16 %v1164_v37, %v1163_v39  ;;  %v1303_v39 = vadd.f32 %v2113_v32, %v1302_v22 }
 0xbda   :  { %v1307_v43 = vpack.c.bf16 %v1303_v39, %v1303_v39 }
 0xbdd   :  { %v1167_v38 = vpop.permute.xlu1 %1166 }
 0xbde   :  { %v1172_v41 = vsel %vm470_vm3, %v1167_v38, 0 }
 0xbdf   :  { %1181 = vmatpush.bf16.msrb.mxu3 %v1172_v41 }
 0xbe2   :  { %1937 = vmatmul.msk.bf16.vlgmr.msrb.gmra.mxu3 %vm438_vm2, %v1165_v42 }
 0xc2f   :  { %v1111_v45 = vpop.f32.mrf.mxu0 }
 0xc30   :  { %v1188_v46 = vpack.c.bf16 %v1111_v45, %v1111_v45 }
 0xc32   :  { %v1198_v48 = vunpack.c.l.b16 %v1188_v46  ;;  %v1305_v46 = vadd.f32 %v2113_v32, %v1304_v44  ;;  %v2114_v32 = vld [vmem:[%s2781_s11] ss:$0 sm:$0xff] }
 0xc37   :  { %v1113_v47 = vpop.f32.mrf.mxu0 }
 0xc38   :  { %v1189_v36 = vpack.c.bf16 %v1113_v47, %v1113_v47  ;;  %v1308_v47 = vpack.c.bf16 %v1305_v46, %v1305_v46 }
 0xc3a   :  { %v1199_v49 = vunpack.c.l.b16 %v1189_v36  ;;  %v2110_v36 = vld [vmem:[%s2777_s12] ss:$0 sm:$0xff] }
 0xc3b   :  { %v2666_v59 = vadd.f32 %v2110_v36, %v2582_v6 }
 0xc3c   :  { %v1202_v50 = vpack.c.b16 %v1199_v49, %v1198_v48  ;;  %v2659_v48 = vadd.f32 %v2110_v36, %v2580_v3 }
 0xc3d   :  { %v1588_v61 = vsel %vm287_vm0, %v2666_v59, -inf }
 0xc3e   :  { %1946 = vmatmul.msk.bf16.vlgmr.msrb.gmra.mxu0 %vm342_vm1, %v1202_v50  ;;  %v1585_v49 = vsel %vm287_vm0, %v2659_v48, -inf }
 0xc65   :  { %v1183_v51 = vpop.f32.mrf.mxu3 }
 0xc66   :  { %v1190_v52 = vpack.c.bf16 %v1183_v51, %v1183_v51 }
 0xc68   :  { %v1200_v56 = vunpack.c.l.b16 %v1190_v52 }
 0xc6d   :  { %v1185_v53 = vpop.f32.mrf.mxu3 }
 0xc6e   :  { %v1191_v54 = vpack.c.bf16 %v1185_v53, %v1185_v53 }
 0xc70   :  { %v1201_v57 = vunpack.c.l.b16 %v1191_v54 }
 0xc72   :  { %v1203_v58 = vpack.c.b16 %v1201_v57, %v1200_v56 }
 0xc74   :  { %1947 = vmatmul.msk.bf16.gmra.mxu0 %vm342_vm1, %v1203_v58 }
 0xc84   :  { %1948 = vmatmul.msk.bf16.gmra.mxu0 %vm342_vm1, %v1208_v55 }
 0xc94   :  { %1949 = vmatmul.msk.bf16.gmra.mxu0 %vm342_vm1, %v2557_v40 }
 0xcbb   :  { %v1242_v62 = vpop.f32.mrf.mxu0 }
 0xcbc   :  { %v1243_v12 = vadd.f32 %v2112_v5, %v1242_v62 }
 0xcbe   :  { %v1262_v15 = vpack.c.bf16 %v1243_v12, %v1243_v12 }
 0xcc0   :  { %v1311_v26 = vunpack.c.l.b16 %v1262_v15 }
 0xcc3   :  { %v1244_v63 = vpop.f32.mrf.mxu0 }
 0xcc4   :  { %v1245_v9 = vadd.f32 %v2112_v5, %v1244_v63 }
 0xcc6   :  { %v1263_v20 = vpack.c.bf16 %v1245_v9, %v1245_v9 }
 0xcc8   :  { %v1312_v23 = vunpack.c.l.b16 %v1263_v20 }
 0xcca   :  { %v1313_v30 = vpack.c.b16 %v1312_v23, %v1311_v26  ;;  %v2048_v26 = vld [vmem:[%s2779_s7 + $0x8] sm:$0xff] }
 0xccc   :  { %v1324_v37 = vsel %vm342_vm1, %v1313_v30, 0 }
 0xcf1   :  { %v1247_v0 = vpop.f32.mrf.mxu0 }
 0xcf2   :  { %v1248_v27 = vadd.f32 %v2112_v5, %v1247_v0 }
 0xcf4   :  { %v1264_v25 = vpack.c.bf16 %v1248_v27, %v1248_v27  ;;  %v2047_v27 = vld [vmem:[%s2779_s7] sm:$0xff] }
 0xcf6   :  { %v1379_v41 = vunpack.c.l.b16 %v1264_v25 }
 0xcf9   :  { %v1249_v1 = vpop.f32.mrf.mxu0 }
 0xcfa   :  { %v1250_v13 = vadd.f32 %v2112_v5, %v1249_v1 }
 0xcfc   :  { %v1265_v31 = vpack.c.bf16 %v1250_v13, %v1250_v13 }
 0xcfe   :  { %v1380_v35 = vunpack.c.l.b16 %v1265_v31  ;;  %v248_v31 = vld [vmem:[%s2774_s19] sm:$0xff]  }
 0xd00   :  { %v1381_v42 = vpack.c.b16 %v1380_v35, %v1379_v41  ;;  %v1446_v41 = vunpack.c.h.bf16 %v248_v31 }
 0xd01   :  { %v1252_v2 = vpop.f32.mrf.mxu0 }
 0xd02   :  { %v1253_v10 = vadd.f32 %v2112_v5, %v1252_v2  ;;  %v1392_v45 = vsel %vm342_vm1, %v1381_v42, 0 }
 0xd04   :  { %v1266_v29 = vpack.c.bf16 %v1253_v10, %v1253_v10 }
 0xd09   :  { %v1254_v4 = vpop.f32.mrf.mxu0 }
 0xd0a   :  { %v1255_v16 = vadd.f32 %v2112_v5, %v1254_v4 }
 0xd0c   :  { %v1267_v33 = vpack.c.bf16 %v1255_v16, %v1255_v16 }
 0xd11   :  { %v1257_v7 = vpop.f32.mrf.mxu0 }
 0xd12   :  { %v1258_v8 = vadd.f32 %v2112_v5, %v1257_v7 }
 0xd14   :  { %v1268_v11 = vpack.c.bf16 %v1258_v8, %v1258_v8 }
 0xd16   :  { %v1315_v14 = vunpack.c.l.b16 %v1268_v11 }
 0xd18   :  { %v1316_v55 = vpack.c.b16 %v1315_v14, %v1315_v14 }
 0xd19   :  { %v1259_v40 = vpop.f32.mrf.mxu0 }
 0xd1a   :  { %v1260_v19 = vadd.f32 %v2112_v5, %v1259_v40  ;;  %v1319_v21 = vsel %vm470_vm3, %v1266_v29, %v1316_v55 }
 0xd1b   :  { %1357 = vrot.lane.b32.xlu1 %v1319_v21, %s2255_s0  ;;  %v1326_v24 = vsel %vm342_vm1, %v1319_v21, 0  ;;  %v2045_v21 = vld [vmem:[%s2778_s20] sm:$0xff] }
 0xd1c   :  { %v1269_v18 = vpack.c.bf16 %v1260_v19, %v1260_v19  ;;  %1334 = vmatpush.bf16.xpose.msrb.mxu2 %v1326_v24  ;;  %v2046_v19 = vld [vmem:[%s2778_s20 + $0x8] sm:$0xff] }
 0xd1e   :  { %v1383_v28 = vunpack.c.l.b16 %v1269_v18 }
 0xd20   :  { %v1384_v34 = vpack.c.b16 %v1383_v28, %v1383_v28  ;;  %v2050_v28 = vld [vmem:[%s2780_s10 + $0x8] sm:$0xff] }
 0xd22   :  { %v1387_v17 = vsel %vm470_vm3, %v1267_v33, %v1384_v34  ;;  %v2257_v33 = vmov 8.0   ;;  %v1445_v34 = vunpack.c.l.bf16 %v248_v31 }
 0xd23   :  { %1355 = vrot.lane.b32.xlu1 %v1313_v30, %s2255_s0  ;;  %v1394_v38 = vsel %vm342_vm1, %v1387_v17, 0  ;;  %v2049_v30 = vld [vmem:[%s2780_s10] sm:$0xff] }
 0xd24   :  { %1335 = vmatpush.bf16.xpose.msrb.mxu2 %v1324_v37  ;;  %1402 = vmatpush.bf16.xpose.msra.mxu1 %v1394_v38 }
 0xd2b   :  { %1423 = vrot.lane.b32.xlu1 %v1381_v42, %s2255_s0  ;;  %1963 = vmatmul.msk.bf16.vlgmr.msrb.gmra.mxu2 %vm342_vm1, %v1307_v43 }
 0xd2c   :  { %1403 = vmatpush.bf16.xpose.msra.mxu1 %v1392_v45 }
 0xd33   :  { %1965 = vmatmul.msk.bf16.vlgmr.msra.gmra.mxu1 %vm342_vm1, %v1308_v47 }
 0xd34   :  { %1507 = vmatpush.bf16.msrb.mxu1 %v2048_v26  ;;  %v2053_v26 = vld [vmem:[%s2784_s18 + $0x10] sm:$0xff] }
 0xd38   :  { %1508 = vmatpush.bf16.msrb.mxu1 %v2047_v27  ;;  %v2052_v27 = vld [vmem:[%s2784_s18 + $0x8] sm:$0xff] }
 0xd55   :  { %1586 = vmax.xlane.f32.xlu1 %v1585_v49 }
 0xd8d   :  { %v1358_v50 = vpop.permute.xlu1 %1357 }
 0xd8e   :  { %1370 = vmatpush.bf16.msra.mxu3 %v1358_v50 }
 0xd95   :  { %v1356_v51 = vpop.permute.xlu1 %1355 }
 0xd96   :  { %1371 = vmatpush.bf16.msra.mxu3 %v1356_v51 }
 0xd9a   :  { %1472 = vmatpush.bf16.msrb.mxu3 %v2046_v19  ;;  %v2116_v19 = vld [vmem:[%s2783_s16] ss:$0 sm:$0xff] }
 0xd9d   :  { %v1424_v15 = vpop.permute.xlu1 %1423 }
 0xd9e   :  { %1473 = vmatpush.bf16.msrb.mxu3 %v2045_v21 }
 0xdae   :  { %v1337_v52 = vpop.f32.mrf.mxu2 }
 0xdaf   :  { %v1341_v53 = vmul.f32 0.17677669, %v1337_v52 }
 0xdb0   :  { %v1405_v54 = vpop.f32.mrf.mxu1 }
 0xdb1   :  { %v1409_v56 = vmul.f32 0.17677669, %v1405_v54  ;;  %v1342_v57 = vsel %vm342_vm1, %v1341_v53, -inf }
 0xdb2   :  { %1343 = vmax.xlane.f32.xlu2 %v1342_v57 }
 0xdb3   :  { %v1410_v58 = vsel %vm342_vm1, %v1409_v56, -inf }
 0xdb4   :  { %1411 = vmax.xlane.f32.xlu0 %v1410_v58 }
 0xdb6   :  { %v1339_v3 = vpop.f32.mrf.mxu2 }
 0xdb8   :  { %v1407_v60 = vpop.f32.mrf.mxu1 }
 0xdbc   :  { %1589 = vmax.xlane.f32.xlu0 %v1588_v61 }
 0xe25   :  { %v1344_v62 = vpop.xlane.xlu2 %1343 }
 0xe26   :  { %v1345_v63 = vsub.f32 %v1341_v53, %v1344_v62 }
 0xe27   :  { %v1412_v0 = vpop.xlane.xlu0 %1411 }
 0xe28   :  { %v1346_v1 = vmul.f32 1.442695, %v1345_v63  ;;  %v1413_v2 = vsub.f32 %v1409_v56, %v1412_v0 }
 0xe2a   :  { %2166 = vpow2.f32 %v1346_v1  ;;  %v1414_v4 = vmul.f32 1.442695, %v1413_v2 }
 0xe2c   :  { %2168 = vpow2.f32 %v1414_v4  ;;  %v2115_v4 = vld [vmem:[%s2782_s15] ss:$0 sm:$0xff] }
 0xe30   :  { %v2167_v5 = vpop.eup %2166 }
 0xe31   :  { %v1348_v7 = vsel %vm342_vm1, %v2167_v5, 0.0 }
 0xe32   :  { %1349 = vadd.xlane.f32.xlu2 %v1348_v7  ;;  %v2169_v8 = vpop.eup %2168 }
 0xe33   :  { %v1416_v6 = vsel %vm342_vm1, %v2169_v8, 0.0 }
 0xe3a   :  { %1417 = vadd.xlane.f32.xlu2 %v1416_v6 }
 0xe52   :  { %1425 = vrot.lane.b32.xlu2 %v1387_v17, %s2255_s0 }
 0xea5   :  { %v1350_v9 = vpop.xlane.xlu2 %1349 }
 0xea6   :  { %2170 = vrcp.f32 %v1350_v9 }
 0xeac   :  { %v2171_v10 = vpop.eup %2170 }
 0xead   :  { %v1352_v11 = vmul.f32 %v2171_v10, %v2167_v5  ;;  %v1418_v12 = vpop.xlane.xlu2 %1417  ;;  %v1587_v5 = vpop.xlane.xlu1 %1586 }
 0xeae   :  { %2172 = vrcp.f32 %v1418_v12  ;;  %v1597_v6 = vsub.f32 %v2659_v48, %v1587_v5 }
 0xeaf   :  { %v1353_v14 = vpack.c.bf16 %v1352_v11, %v1352_v11  ;;  %2174 = vrcp.f32 %v2257_v33  ;;  %v1590_v11 = vpop.xlane.xlu0 %1589 }
 0xeb0   :  { %v1601_v10 = vmul.f32 1.442695, %v1597_v6 }
 0xeb1   :  { %1964 = vmatmul.msk.bf16.vlgmr.msra.gmra.mxu3 %vm342_vm1, %v1353_v14 }
 0xeb2   :  { %2176 = vpow2.f32 %v1601_v10 }
 0xeb4   :  { %v2173_v20 = vpop.eup %2172 }
 0xeb5   :  { %v1426_v29 = vpop.permute.xlu2 %1425  ;;  %v1420_v55 = vmul.f32 %v2173_v20, %v2169_v8  ;;  %v2175_v35 = vpop.eup %2174  ;;  %v1598_v20 = vsub.f32 %v2666_v59, %v1590_v11 }
 0xeb6   :  { %1438 = vmatpush.bf16.msra.mxu2 %v1426_v29  ;;  %v1535_v39 = vmul.f32 8.0, %v2175_v35  ;;  %vm1539_vm5 = vweird.f32 %v2175_v35 }
 0xeb7   :  { %v1421_v40 = vpack.c.bf16 %v1420_v55, %v1420_v55  ;;  %v1603_v55 = vmul.f32 1.442695, %v1598_v20 }
 0xeb8   :  { %v1536_v46 = vsub.f32 1.0, %v1535_v39 }
 0xeb9   :  { %2178 = vpow2.f32 %v1603_v55 }
 0xeba   :  { %1439 = vmatpush.bf16.msra.mxu2 %v1424_v15  ;;  %v1537_v52 = vmul.f32 %v2175_v35, %v1536_v46  ;;  %v2177_v15 = vpop.eup %2176 }
 0xebc   :  { %v1538_v57 = vadd.f32 %v2175_v35, %v1537_v52 }
 0xebd   :  { %1966 = vmatmul.msk.bf16.vlgmr.msra.gmra.mxu2 %vm342_vm1, %v1421_v40  ;;  %v1609_v40 = vsel %vm287_vm0, %v2177_v15, 0.0 }
 0xebe   :  { %1577 = vmatpush.bf16.msrb.mxu2 %v2050_v28  ;;  %v2687_v61 = vsel %vm1539_vm5, %v2175_v35, %v1538_v57  ;;  %v2051_v28 = vld [vmem:[%s2784_s18] sm:$0xff] }
 0xec2   :  { %1578 = vmatpush.bf16.msrb.mxu2 %v2049_v30 }
 0xf34   :  { %v1373_v23 = vpop.f32.mrf.mxu3 }
 0xf3c   :  { %v1375_v13 = vpop.f32.mrf.mxu3 }
 0xf3d   :  { %v2179_v13 = vpop.eup %2178 }
 0xf40   :  { %v1441_v24 = vpop.f32.mrf.mxu2 }
 0xf41   :  { %v1447_v16 = vpack.c.bf16 %v1441_v24, %v1373_v23  ;;  %v1612_v24 = vsel %vm287_vm0, %v2179_v13, 0.0 }
 0xf43   :  { %1975 = vmatmul.msk.bf16.vlgmr.msrb.gmra.mxu3 %vm342_vm1, %v1447_v16 }
 0xf48   :  { %v1443_v18 = vpop.f32.mrf.mxu2 }
 0xf49   :  { %v2054_v18 = vld [vmem:[%s2784_s18 + $0x18] sm:$0xff] }
 0xf4a   :  { %1665 = vmatpush.bf16.msra.mxu3 %v2054_v18 }
 0xf4e   :  { %1666 = vmatpush.bf16.msra.mxu3 %v2053_v26 }
 0xf52   :  { %1667 = vmatpush.bf16.msra.mxu3 %v2052_v27 }
 0xf56   :  { %1668 = vmatpush.bf16.msra.mxu3 %v2051_v28 }
 0xfc6   :  { %v1475_v22 = vpop.f32.mrf.mxu3 }
 0xfc7   :  { %v1476_v25 = vadd.f32 %v2114_v32, %v1475_v22 }
 0xfc9   :  { %v1480_v17 = vadd.f32 %v1476_v25, %v1445_v34 }
 0xfcb   :  { %v1527_v37 = vsel %vm342_vm1, %v1480_v17, 0.0 }
 0xfcc   :  { %v1528_v38 = vrot.slane %v1527_v37, 4 }
 0xfce   :  { %v1529_v42 = vadd.f32 %v1528_v38, %v1527_v37  ;;  %v1477_v43 = vpop.f32.mrf.mxu3 }
 0xfcf   :  { %v1478_v44 = vadd.f32 %v2114_v32, %v1477_v43 }
 0xfd0   :  { %v1530_v45 = vrot.slane %v1529_v42, 2 }
 0xfd1   :  { %v1481_v47 = vadd.f32 %v1478_v44, %v1446_v41 }
 0xfd2   :  { %v1531_v50 = vadd.f32 %v1530_v45, %v1529_v42 }
 0xfd3   :  { %v1482_v36 = vpack.c.bf16 %v1481_v47, %v1480_v17  ;;  %v1542_v49 = vsel %vm342_vm1, %v1481_v47, 0.0 }
 0xfd4   :  { %v1543_v51 = vrot.slane %v1542_v49, 4  ;;  %v1532_v54 = vrot.slane %v1531_v50, 1 }
 0xfd5   :  { %1984 = vmatmul.msk.bf16.vlgmr.msrb.gmra.mxu1 %vm342_vm1, %v1482_v36 }
 0xfd6   :  { %v1544_v53 = vadd.f32 %v1543_v51, %v1542_v49  ;;  %v1533_v3 = vadd.f32 %v1532_v54, %v1531_v50 }
 0xfd8   :  { %v1545_v56 = vrot.slane %v1544_v53, 2  ;;  %v1541_v63 = vmul.f32 %v2687_v61, %v1533_v3 }
 0xfda   :  { %v1546_v58 = vadd.f32 %v1545_v56, %v1544_v53 }
 0xfdc   :  { %v1547_v60 = vrot.slane %v1546_v58, 1 }
 0xfde   :  { %v1548_v62 = vadd.f32 %v1547_v60, %v1546_v58  ;;  %v2056_v58 = vld [vmem:[%s2785_s22 + $0x8] sm:$0xff]  ;;  %v2055_v60 = vld [vmem:[%s2785_s22] sm:$0xff] }
 0xfdf   :  { %1742 = vmatpush.bf16.msra.mxu1 %v2056_v58 }
 0xfe0   :  { %v1549_v0 = vmul.f32 %v1548_v62, %v2687_v61 }
 0xfe2   :  { %v1551_v1 = vsel %vm1550_vm6, %v1541_v63, %v1549_v0 }
 0xfe3   :  { %v1552_v2 = vpack.c.bf16 %v1551_v1, %v1551_v1  ;;  %1743 = vmatpush.bf16.msra.mxu1 %v2055_v60 }
 0xfe5   :  { %1993 = vmatmul.msk.bf16.vlgmr.msrb.gmra.mxu2 %vm342_vm1, %v1552_v2 }
0x1052   :  { %v1510_v7 = vpop.f32.mrf.mxu1 }
0x1053   :  { %v1511_v8 = vadd.f32 %v2115_v4, %v1510_v7 }
0x1055   :  { %v1591_v9 = vsel %vm287_vm0, %v1511_v8, -inf }
0x1056   :  { %1592 = vmax.xlane.f32.xlu2 %v1591_v9 }
0x105a   :  { %v1512_v12 = vpop.f32.mrf.mxu1 }
0x105b   :  { %v1513_v14 = vadd.f32 %v2115_v4, %v1512_v12 }
0x105d   :  { %v1594_v29 = vsel %vm287_vm0, %v1513_v14, -inf }
0x105e   :  { %1595 = vmax.xlane.f32.xlu0 %v1594_v29 }
0x1066   :  { %1610 = vadd.xlane.f32.xlu0 %v1609_v40 }
0x1068   :  { %v1580_v21 = vpop.f32.mrf.mxu2 }
0x1069   :  { %v1581_v23 = vadd.f32 %v2116_v19, %v1580_v21 }
0x106b   :  { %1584 = vst [vmem:[#allocation2] sm:$0x3] %v1581_v23 }
0x106e   :  { %1613 = vadd.xlane.f32.xlu0 %v1612_v24  ;;  %1519 = vrot.lane.b32.xlu2 %v1513_v14, %s2256_s13 }
0x1070   :  { %v1582_v16 = vpop.f32.mrf.mxu2 }
0x10c9   :  { %v1593_v30 = vpop.xlane.xlu2 %1592 }
0x10ca   :  { %v1599_v31 = vsub.f32 %v1511_v8, %v1593_v30 }
0x10cc   :  { %v1605_v32 = vmul.f32 1.442695, %v1599_v31 }
0x10ce   :  { %2180 = vpow2.f32 %v1605_v32 }
0x10d1   :  { %v1596_v33 = vpop.xlane.xlu0 %1595  ;;  %v1520_v34 = vpop.permute.xlu2 %1519 }
0x10d2   :  { %v1600_v22 = vsub.f32 %v1513_v14, %v1596_v33  ;;  %v1524_v25 = vsel %vm287_vm0, %v2666_v59, %v1520_v34 }
0x10d3   :  { %1526 = vst [vmem:[%s2442_s6 + $0x8] sm:$0xff] %v1524_v25 }
0x10d4   :  { %v2181_v17 = vpop.eup %2180  ;;  %v1607_v35 = vmul.f32 1.442695, %v1600_v22 }
0x10d5   :  { %v1615_v37 = vsel %vm287_vm0, %v2181_v17, 0.0 }
0x10d6   :  { %2182 = vpow2.f32 %v1607_v35  ;;  %1616 = vadd.xlane.f32.xlu0 %v1615_v37 }
0x10d9   :  { %v1611_v38 = vpop.xlane.xlu0 %1610 }
0x10da   :  { %2184 = vrcp.f32 %v1611_v38 }
0x10dc   :  { %v2183_v39 = vpop.eup %2182 }
0x10dd   :  { %v1618_v41 = vsel %vm287_vm0, %v2183_v39, 0.0 }
0x10de   :  { %1619 = vadd.xlane.f32.xlu1 %v1618_v41 }
0x10e0   :  { %v2185_v43 = vpop.eup %2184 }
0x10e1   :  { %v1614_v42 = vpop.xlane.xlu0 %1613  ;;  %v1625_v45 = vmul.f32 %v2185_v43, %v2177_v15 }
0x10e2   :  { %2186 = vrcp.f32 %v1614_v42 }
0x10e8   :  { %v2187_v44 = vpop.eup %2186 }
0x10e9   :  { %v1626_v46 = vmul.f32 %v2187_v44, %v2179_v13 }
0x10ea   :  { %1517 = vrot.lane.b32.xlu0 %v1511_v8, %s2256_s13 }
0x10eb   :  { %v1629_v59 = vpack.c.bf16 %v1626_v46, %v1625_v45 }
0x10ed   :  { %2010 = vmatmul.msk.bf16.vlgmr.msra.gmra.mxu3 %vm287_vm0, %v1629_v59 }
0x1149   :  { %v1617_v47 = vpop.xlane.xlu0 %1616 }
0x114a   :  { %2188 = vrcp.f32 %v1617_v47 }
0x1150   :  { %v2189_v49 = vpop.eup %2188 }
0x1151   :  { %v1620_v36 = vpop.xlane.xlu1 %1619  ;;  %v1627_v51 = vmul.f32 %v2189_v49, %v2181_v17 }
0x1152   :  { %2190 = vrcp.f32 %v1620_v36 }
0x1158   :  { %v2191_v50 = vpop.eup %2190 }
0x1159   :  { %v1628_v52 = vmul.f32 %v2191_v50, %v2183_v39 }
0x115b   :  { %v1630_v53 = vpack.c.bf16 %v1628_v52, %v1627_v51 }
0x115c   :  { %v1518_v54 = vpop.permute.xlu0 %1517 }
0x115d   :  { %v1523_v56 = vsel %vm287_vm0, %v2659_v48, %v1518_v54  ;;  %2011 = vmatmul.msk.bf16.gmra.mxu3 %vm287_vm0, %v1630_v53 }
0x115e   :  { %1525 = vst [vmem:[%s2442_s6] sm:$0xff] %v1523_v56  ;;  %s2258_s6 = smov [#allocation2]  }
0x115f   :  { %s1757_s23 = sshll.u32 %s2258_s6, 4  ;;  %s1758_s23 = int_to_ptr.vmem [resolvable:$true] %s1757_s23 }
0x1170   :  { %v1670_v57 = vpop.f32.mrf.mxu3 }
0x1171   :  { %v1680_v63 = vsel %vm342_vm1, %v1670_v57, 0.0 }
0x1172   :  { %v1681_v1 = vrot.slane %v1680_v63, 4 }
0x1174   :  { %v1682_v4 = vadd.f32 %v1681_v1, %v1680_v63 }
0x1176   :  { %v1683_v6 = vrot.slane %v1682_v4, 2 }
0x1178   :  { %v1672_v3 = vpop.f32.mrf.mxu3  ;;  %v1684_v12 = vadd.f32 %v1683_v6, %v1682_v4 }
0x1179   :  { %v1688_v62 = vsel %vm342_vm1, %v1672_v3, 0.0 }
0x117a   :  { %v1689_v0 = vrot.slane %v1688_v62, 4  ;;  %v1685_v19 = vrot.slane %v1684_v12, 1 }
0x117c   :  { %v1690_v2 = vadd.f32 %v1689_v0, %v1688_v62  ;;  %v1686_v16 = vadd.f32 %v1685_v19, %v1684_v12 }
0x117e   :  { %v1691_v7 = vrot.slane %v1690_v2, 2  ;;  %v1687_v30 = vmul.f32 %v1686_v16, %v2687_v61 }
0x1180   :  { %v1692_v10 = vadd.f32 %v1691_v7, %v1690_v2 }
0x1182   :  { %v1693_v55 = vrot.slane %v1692_v10, 1 }
0x1184   :  { %v1694_v23 = vadd.f32 %v1693_v55, %v1692_v10 }
0x1186   :  { %v1695_v26 = vmul.f32 %v1694_v23, %v2687_v61 }
0x1188   :  { %v1712_v32 = vsel %vm1550_vm6, %v1687_v30, %v1695_v26 }
0x11e0   :  { %v1675_v5 = vpop.f32.mrf.mxu3 }
0x11e1   :  { %v1696_v48 = vsel %vm342_vm1, %v1675_v5, 0.0 }
0x11e2   :  { %v1697_v8 = vrot.slane %v1696_v48, 4 }
0x11e4   :  { %v1698_v9 = vadd.f32 %v1697_v8, %v1696_v48 }
0x11e6   :  { %v1699_v11 = vrot.slane %v1698_v9, 2 }
0x11e8   :  { %v1700_v14 = vadd.f32 %v1699_v11, %v1698_v9  ;;  %v1677_v20 = vpop.f32.mrf.mxu3 }
0x11e9   :  { %v1704_v29 = vsel %vm342_vm1, %v1677_v20, 0.0 }
0x11ea   :  { %v1705_v15 = vrot.slane %v1704_v29, 4  ;;  %v1701_v40 = vrot.slane %v1700_v14, 1 }
0x11ec   :  { %v1706_v21 = vadd.f32 %v1705_v15, %v1704_v29  ;;  %v1702_v24 = vadd.f32 %v1701_v40, %v1700_v14 }
0x11ee   :  { %v1707_v13 = vrot.slane %v1706_v21, 2  ;;  %v1703_v28 = vmul.f32 %v1702_v24, %v2687_v61 }
0x11f0   :  { %v1708_v18 = vadd.f32 %v1707_v13, %v1706_v21  ;;  %v1714_v34 = vsel %vm1713_vm7, %v1712_v32, %v1703_v28 }
0x11f2   :  { %v1709_v27 = vrot.slane %v1708_v18, 1 }
0x11f4   :  { %v1710_v31 = vadd.f32 %v1709_v27, %v1708_v18 }
0x11f6   :  { %v1711_v33 = vmul.f32 %v1710_v31, %v2687_v61 }
0x11f8   :  { %v1716_v22 = vsel %vm1715_vm8, %v1714_v34, %v1711_v33 }
0x11f9   :  { %v1717_v25 = vpack.c.bf16 %v1716_v22, %v1716_v22 }
0x11fb   :  { %2020 = vmatmul.msk.bf16.vlgmr.msra.gmra.mxu1 %vm342_vm1, %v1717_v25 }
0x11fc   :  { %2215 = shalt.err (!%p2212_p4)
}
0x11fd   :  { %1762 = dma.vmem_to_hbm [thread:$0]  %s1758_s23, 32, %s1760_s26, [#allocation3]   ;;  %v2117_v61 = vld [vmem:[%s2437_s17] ss:$0 sm:$0xff] }
0x1278   :  { %v1745_v17 = vpop.f32.mrf.mxu1 }
0x1279   :  { %v1746_v35 = vadd.f32 %v2117_v61, %v1745_v17 }
0x127b   :  { %1749 = vst [vmem:[%s2452_s4] sm:$0xf] %v1746_v35 }
0x1280   :  { %v1747_v37 = vpop.f32.mrf.mxu1 }
0x1281   :  { %2216 = dma.done.wait [#allocation3], 32  }
0x1282   :  { %2217 = vsyncadd [#allocation3], 4294967264 }
0x1283   :  { %1773 = vsyncpa [#allocation3], 1 }

</bundles_post_ra>
